<compile_context>
chip_gen: v7x
topology: tpu7x:2x2x1
jax: 0.10.0
libtpu: 0.0.40
codegen_flags: <defaults>
</compile_context>

<pallas_src>
import math

import jax
import jax.numpy as jnp
from jax.experimental import pallas as pl
from jax.experimental.pallas import tpu as pltpu  # noqa: F401  (TPU backend)

# ----------------------- small synthetic configuration -----------------------
VOCAB = 30
VOCAB_PAD = 32       # pad vocab table rows to a sublane multiple
HIDDEN = 32          # BERT hidden size
N_HEADS = 2
HEAD_DIM = HIDDEN // N_HEADS
INTER = 64           # BERT intermediate (FFN) size
N_LAYERS = 2
SEQ = 8
BATCH = 2
BS = BATCH * SEQ
MHC_DIM = 32
EMB_DIM = HIDDEN + MHC_DIM   # decoder in_features (CLS ++ MHC encoding)
LN_EPS = 1e-12
ATT_SCALE = 1.0 / math.sqrt(HEAD_DIM)

# rough cost hints for the single custom call (scheduling hint only)
_FLOPS = 2 * (BS * VOCAB_PAD * HIDDEN
              + N_LAYERS * (BS * HIDDEN * 3 * HIDDEN          # fused QKV
                            + 2 * N_HEADS * BS * BS * HEAD_DIM  # scores + ctx
                            + BS * HIDDEN * HIDDEN              # attn out proj
                            + 2 * BS * HIDDEN * INTER)          # FFN
              + BATCH * (EMB_DIM * 1024 + 1024 * 256 + 256))
_TRANSCENDENTALS = (N_LAYERS * (N_HEADS * BS * BS   # softmax exp
                                + N_HEADS * BS      # approx reciprocal
                                + BS * INTER        # gelu tanh
                                + 3 * BS)           # LN rsqrt
                    + BATCH)                        # sigmoid


# --------------------------------- kernel ------------------------------------
def _layer_norm(y, gamma, beta):
    mean = jnp.mean(y, axis=-1, keepdims=True)
    var = jnp.mean((y - mean) ** 2, axis=-1, keepdims=True)
    return (y - mean) * jax.lax.rsqrt(var + LN_EPS) * gamma + beta


def fused_forward_kernel(
        ids_ref, extra_ref, bias_ref, mhc_ref,
        word_ref, embln_ref,
        wqkv_ref, bqkv_ref, wo_ref, wi_ref, bi_ref, wf_ref, lnv_ref,
        dw1a_ref, dw1b_ref, db1_ref, dw2_ref, db2_ref, dw3_ref, db3_ref,
        out_ref):
    f32 = jnp.float32
    bf16 = jnp.bfloat16

    # ------------------- embeddings (gather via one-hot matmul) -------------
    ids = ids_ref[...]                                            # (BS, 1) i32
    vocab_iota = jax.lax.broadcasted_iota(jnp.int32, (BS, VOCAB_PAD), 1)
    word_onehot = (vocab_iota == ids).astype(f32)                 # (BS, VP)
    word_emb = jnp.dot(word_onehot, word_ref[...], preferred_element_type=f32)

    embln = embln_ref[...]                                        # (2, H)
    # pos + token-type embeddings precomputed in the wrapper -> extra_ref
    x = _layer_norm(word_emb + extra_ref[...], embln[0:1, :], embln[1:2, :])

    # precomputed additive attention bias: block-diagonal over batches with
    # key-padding -1e9 already folded in.
    bias = bias_ref[...]                                          # (BS, BS)

    # -------------------- encoder layers (statically unrolled) --------------
    for l in range(N_LAYERS):
        lv = lnv_ref[l]                                           # (6, H)
        # One fused QKV matmul on the flattened (BS, H) activation.
        qkv = (jnp.dot(x.astype(bf16), wqkv_ref[l], preferred_element_type=f32)
               + bqkv_ref[l])                                     # (BS, 3H)

        ctx_heads = []
        for h in range(N_HEADS):                                  # static lane slices
            q = qkv[:, h * HEAD_DIM:(h + 1) * HEAD_DIM]
            k = qkv[:, HIDDEN + h * HEAD_DIM:HIDDEN + (h + 1) * HEAD_DIM]
            v = qkv[:, 2 * HIDDEN + h * HEAD_DIM:2 * HIDDEN + (h + 1) * HEAD_DIM]
            # scores over all BS rows at once; block-diag mask kills cross-batch
            s = jax.lax.dot_general(q, k, (((1,), (1,)), ((), ())),
                                    preferred_element_type=f32)   # (BS, BS)
            s = s * ATT_SCALE + bias
            s = s - jnp.max(s, axis=-1, keepdims=True)
            p = jnp.exp(s)
            p = p * pl.reciprocal(jnp.sum(p, axis=-1, keepdims=True), approx=True)
            ctx_heads.append(jnp.dot(p, v, preferred_element_type=f32))  # (BS, D)

        ctx = jnp.concatenate(ctx_heads, axis=-1)                 # (BS, H) lane concat
        attn = (jnp.dot(ctx.astype(bf16), wo_ref[l], preferred_element_type=f32)
                + lv[0:1, :])                                     # + bo

        h1 = _layer_norm(x + attn, lv[1:2, :], lv[2:3, :])
        inter = (jnp.dot(h1.astype(bf16), wi_ref[l], preferred_element_type=f32)
                 + bi_ref[l])
        # TODO(synk): HF BERT uses exact erf GELU; tanh approximation kept here.
        inter = jax.nn.gelu(inter)
        ff = (jnp.dot(inter.astype(bf16), wf_ref[l], preferred_element_type=f32)
              + lv[3:4, :])                                       # + bf
        x = _layer_norm(h1 + ff, lv[4:5, :], lv[5:6, :])

    # -------------------- CLS ++ MHC -> decoder MLP -> sigmoid --------------
    cls = jnp.concatenate([x[b * SEQ:b * SEQ + 1, :] for b in range(BATCH)], axis=0)
    cls_b = cls.astype(bf16)
    mhc_b = mhc_ref[...].astype(bf16)
    # Linear([cls | mhc]) == cls @ W1[:H] + mhc @ W1[H:]  (avoids a lane concat)
    hdec = (jnp.dot(cls_b, dw1a_ref[...], preferred_element_type=f32)
            + jnp.dot(mhc_b, dw1b_ref[...], preferred_element_type=f32)
            + db1_ref[...])
    hdec = jnp.maximum(hdec, 0.0)
    hdec = jnp.maximum(
        jnp.dot(hdec.astype(bf16), dw2_ref[...], preferred_element_type=f32)
        + db2_ref[...], 0.0)
    logit = jnp.dot(hdec, dw3_ref[...], preferred_element_type=f32) + db3_ref[...]
    out_ref[...] = jax.nn.sigmoid(logit)


# -------------------------------- parameters ----------------------------------
def make_params(key):
    """Synthetic init in the PyTorch layout (the original loads a pretrained BertModel)."""
    scale = 0.02
    keys = iter(jax.random.split(key, 32))

    def dense(fan_in, fan_out):
        return scale * jax.random.normal(next(keys), (fan_in, fan_out), jnp.float32)

    emb = {
        "word": scale * jax.random.normal(next(keys), (VOCAB, HIDDEN), jnp.float32),
        "pos": scale * jax.random.normal(next(keys), (SEQ, HIDDEN), jnp.float32),
        "tok": scale * jax.random.normal(next(keys), (2, HIDDEN), jnp.float32),
        "ln_g": jnp.ones((HIDDEN,), jnp.float32),
        "ln_b": jnp.zeros((HIDDEN,), jnp.float32),
    }
    layers = []
    for _ in range(N_LAYERS):
        layers.append({
            "wq": dense(HIDDEN, HIDDEN), "bq": jnp.zeros((HIDDEN,), jnp.float32),
            "wk": dense(HIDDEN, HIDDEN), "bk": jnp.zeros((HIDDEN,), jnp.float32),
            "wv": dense(HIDDEN, HIDDEN), "bv": jnp.zeros((HIDDEN,), jnp.float32),
            "wo": dense(HIDDEN, HIDDEN), "bo": jnp.zeros((HIDDEN,), jnp.float32),
            "ln1_g": jnp.ones((HIDDEN,), jnp.float32),
            "ln1_b": jnp.zeros((HIDDEN,), jnp.float32),
            "wi": dense(HIDDEN, INTER), "bi": jnp.zeros((INTER,), jnp.float32),
            "wf": dense(INTER, HIDDEN), "bf": jnp.zeros((HIDDEN,), jnp.float32),
            "ln2_g": jnp.ones((HIDDEN,), jnp.float32),
            "ln2_b": jnp.zeros((HIDDEN,), jnp.float32),
        })
    decoder = {
        "w1": dense(EMB_DIM, 1024), "b1": jnp.zeros((1024,), jnp.float32),
        "w2": dense(1024, 256),     "b2": jnp.zeros((256,), jnp.float32),
        "w3": dense(256, 1),        "b3": jnp.zeros((1,), jnp.float32),
    }
    return {"emb": emb, "layers": layers, "decoder": decoder}


def pack_params(params):
    """PyTorch layout -> fused-kernel layout: fused QKV, stacked layer vectors,
    bf16 matmul weights, plus the tables the wrapper needs for precompute."""
    emb = params["emb"]
    word = jnp.zeros((VOCAB_PAD, HIDDEN), jnp.float32).at[:VOCAB].set(emb["word"])
    emb_ln = jnp.stack([emb["ln_g"], emb["ln_b"]], axis=0)        # (2, H)

    L = params["layers"]
    stk = lambda xs: jnp.stack(xs, axis=0)
    wqkv = stk([jnp.concatenate([l["wq"], l["wk"], l["wv"]], axis=1)
                for l in L]).astype(jnp.bfloat16)                 # (L, H, 3H)
    bqkv = stk([jnp.concatenate([l["bq"], l["bk"], l["bv"]], axis=0)
                .reshape(1, 3 * HIDDEN) for l in L])              # (L, 1, 3H) f32
    wo = stk([l["wo"] for l in L]).astype(jnp.bfloat16)           # (L, H, H)
    wi = stk([l["wi"] for l in L]).astype(jnp.bfloat16)           # (L, H, I)
    bi = stk([l["bi"].reshape(1, INTER) for l in L])              # (L, 1, I) f32
    wf = stk([l["wf"] for l in L]).astype(jnp.bfloat16)           # (L, I, H)
    # per-layer vectors stacked: rows = [bo, ln1_g, ln1_b, bf, ln2_g, ln2_b]
    lnv = stk([jnp.stack([l["bo"], l["ln1_g"], l["ln1_b"],
                          l["bf"], l["ln2_g"], l["ln2_b"]], axis=0)
               for l in L])                                       # (L, 6, H) f32

    dec = params["decoder"]
    dw1a = dec["w1"][:HIDDEN].astype(jnp.bfloat16)   # CLS half of Linear(EMB_DIM,1024)
    dw1b = dec["w1"][HIDDEN:].astype(jnp.bfloat16)   # MHC half
    db1 = dec["b1"].reshape(1, 1024)
    dw2 = dec["w2"].astype(jnp.bfloat16)
    db2 = dec["b2"].reshape(1, 256)
    dw3 = dec["w3"]                                   # (256, 1) kept f32
    db3 = dec["b3"].reshape(1, 1)

    kernel_args = (word, emb_ln, wqkv, bqkv, wo, wi, bi, wf, lnv,
                   dw1a, dw1b, db1, dw2, db2, dw3, db3)
    return {"kernel_args": kernel_args, "pos": emb["pos"], "tok": emb["tok"]}


# --------------------------------- forward ------------------------------------
@jax.jit
def epitope_bert_mhc_forward(epitope, mhc_encoding, packed):
    ids = epitope["input_ids"].astype(jnp.int32).reshape(BS, 1)
    tok_ids = epitope["token_type_ids"].astype(jnp.int32).reshape(BS)
    mask = epitope["attention_mask"].astype(jnp.float32)          # (B, S)

    # wrapper precompute (fewer kernel operands / no in-kernel broadcast concats)
    pos_tiled = jnp.tile(packed["pos"], (BATCH, 1))               # (BS, H)
    tok_emb = jnp.take(packed["tok"], tok_ids, axis=0)            # (BS, H)
    extra_emb = (pos_tiled + tok_emb).astype(jnp.float32)

    key_bias = (1.0 - mask.reshape(BS)) * -1e9                    # per key column
    block = jnp.kron(jnp.eye(BATCH, dtype=jnp.float32),
                     jnp.ones((SEQ, SEQ), jnp.float32))           # (BS, BS)
    attn_bias = jnp.where(block > 0.5, key_bias[None, :], -1e9).astype(jnp.float32)

    args = (ids, extra_emb, attn_bias, mhc_encoding.astype(jnp.float32),
            *packed["kernel_args"])
    bytes_accessed = (sum(math.prod(a.shape) * a.dtype.itemsize for a in args)
                      + BATCH * 4)

    out = pl.pallas_call(
        fused_forward_kernel,
        out_shape=jax.ShapeDtypeStruct((BATCH, 1), jnp.float32),
        cost_estimate=pl.CostEstimate(flops=_FLOPS,
                                      transcendentals=_TRANSCENDENTALS,
                                      bytes_accessed=bytes_accessed),
    )(*args)
    return jnp.squeeze(out)                                       # torch.squeeze


# ----------------------------------- main --------------------------------------
if __name__ == "__main__":
    key = jax.random.PRNGKey(0)
    k_param, k_ids, k_mhc = jax.random.split(key, 3)

    params = make_params(k_param)
    packed = pack_params(params)

    input_ids = jax.random.randint(k_ids, (BATCH, SEQ), 0, VOCAB, dtype=jnp.int32)
    attention_mask = jnp.ones((BATCH, SEQ), jnp.int32).at[1, SEQ - 2:].set(0)  # exercise masking
    token_type_ids = jnp.zeros((BATCH, SEQ), jnp.int32)
    epitope = {
        "input_ids": input_ids,
        "attention_mask": attention_mask,
        "token_type_ids": token_type_ids,
    }
    mhc_encoding = jax.random.normal(k_mhc, (BATCH, MHC_DIM), jnp.float32)

    out = epitope_bert_mhc_forward(epitope, mhc_encoding, packed)
    jax.block_until_ready(out)
    assert out.shape == (BATCH,)
    assert bool(jnp.all((out >= 0.0) & (out <= 1.0)))
    print("KERNEL_OK")
</pallas_src>

<mosaic_0001>
module attributes {stable_mosaic.version = 11 : i64} {
  func.func @fused_forward_kernel(%arg0: memref<16x1xi32, #tpu.memory_space<vmem>>, %arg1: memref<16x32xf32, #tpu.memory_space<vmem>>, %arg2: memref<16x16xf32, #tpu.memory_space<vmem>>, %arg3: memref<2x32xf32, #tpu.memory_space<vmem>>, %arg4: memref<32x32xf32, #tpu.memory_space<vmem>>, %arg5: memref<2x32xf32, #tpu.memory_space<vmem>>, %arg6: memref<2x32x96xbf16, #tpu.memory_space<vmem>>, %arg7: memref<2x1x96xf32, #tpu.memory_space<vmem>>, %arg8: memref<2x32x32xbf16, #tpu.memory_space<vmem>>, %arg9: memref<2x32x64xbf16, #tpu.memory_space<vmem>>, %arg10: memref<2x1x64xf32, #tpu.memory_space<vmem>>, %arg11: memref<2x64x32xbf16, #tpu.memory_space<vmem>>, %arg12: memref<2x6x32xf32, #tpu.memory_space<vmem>>, %arg13: memref<32x1024xbf16, #tpu.memory_space<vmem>>, %arg14: memref<32x1024xbf16, #tpu.memory_space<vmem>>, %arg15: memref<1x1024xf32, #tpu.memory_space<vmem>>, %arg16: memref<1024x256xbf16, #tpu.memory_space<vmem>>, %arg17: memref<1x256xf32, #tpu.memory_space<vmem>>, %arg18: memref<256x1xf32, #tpu.memory_space<vmem>>, %arg19: memref<1x1xf32, #tpu.memory_space<vmem>>, %arg20: memref<2x1xf32, #tpu.memory_space<vmem>>) attributes {dimension_semantics = [], scalar_prefetch = 0 : i64, scratch_operands = 0 : i64, tpu.core_type = #tpu.core_type<tc>} {
    %c0 = arith.constant 0 : index
    %c0_0 = arith.constant 0 : index
    %0 = vector.load %arg0[%c0, %c0_0] : memref<16x1xi32, #tpu.memory_space<vmem>>, vector<16x1xi32>
    %1 = tpu.iota {dimensions = array<i32: 1>} : vector<16x32xi32>
    %2 = vector.broadcast %0 : vector<16x1xi32> to vector<16x32xi32>
    %3 = arith.cmpi eq, %1, %2 : vector<16x32xi32>
    %4 = arith.extui %3 : vector<16x32xi1> to vector<16x32xi32>
    %5 = arith.sitofp %4 : vector<16x32xi32> to vector<16x32xf32>
    %c0_1 = arith.constant 0 : index
    %c0_2 = arith.constant 0 : index
    %6 = vector.load %arg4[%c0_1, %c0_2] : memref<32x32xf32, #tpu.memory_space<vmem>>, vector<32x32xf32>
    %cst = arith.constant dense<0.000000e+00> : vector<16x32xf32>
    %7 = tpu.matmul %5, %6, %cst {dimension_numbers = #tpu.dot_dimension_numbers<[1], [0], [0], [1], [0, 0, 1, 1], [], []>} : vector<16x32xf32>, vector<32x32xf32>, vector<16x32xf32> -> vector<16x32xf32>
    %c0_3 = arith.constant 0 : index
    %c0_4 = arith.constant 0 : index
    %8 = vector.load %arg5[%c0_3, %c0_4] : memref<2x32xf32, #tpu.memory_space<vmem>>, vector<2x32xf32>
    %c0_5 = arith.constant 0 : index
    %c0_6 = arith.constant 0 : index
    %9 = vector.load %arg1[%c0_5, %c0_6] : memref<16x32xf32, #tpu.memory_space<vmem>>, vector<16x32xf32>
    %10 = arith.addf %7, %9 : vector<16x32xf32>
    %11 = vector.extract_strided_slice %8 {offsets = [0, 0], sizes = [1, 32], strides = [1, 1]} : vector<2x32xf32> to vector<1x32xf32>
    %12 = vector.extract_strided_slice %8 {offsets = [1, 0], sizes = [1, 32], strides = [1, 1]} : vector<2x32xf32> to vector<1x32xf32>
    %cst_7 = arith.constant dense<0.000000e+00> : vector<16xf32>
    %13 = vector.multi_reduction <add>, %10, %cst_7 [1] : vector<16x32xf32> to vector<16xf32>
    %14 = vector.shape_cast %13 : vector<16xf32> to vector<16x1xf32>
    %cst_8 = arith.constant 3.200000e+01 : f32
    %15 = vector.broadcast %cst_8 : f32 to vector<16x1xf32>
    %16 = arith.divf %14, %15 : vector<16x1xf32>
    %17 = vector.broadcast %16 : vector<16x1xf32> to vector<16x32xf32>
    %18 = arith.subf %10, %17 : vector<16x32xf32>
    %19 = arith.mulf %18, %18 : vector<16x32xf32>
    %cst_9 = arith.constant dense<0.000000e+00> : vector<16xf32>
    %20 = vector.multi_reduction <add>, %19, %cst_9 [1] : vector<16x32xf32> to vector<16xf32>
    %21 = vector.shape_cast %20 : vector<16xf32> to vector<16x1xf32>
    %cst_10 = arith.constant 3.200000e+01 : f32
    %22 = vector.broadcast %cst_10 : f32 to vector<16x1xf32>
    %23 = arith.divf %21, %22 : vector<16x1xf32>
    %24 = vector.broadcast %16 : vector<16x1xf32> to vector<16x32xf32>
    %25 = arith.subf %10, %24 : vector<16x32xf32>
    %cst_11 = arith.constant 9.99999996E-13 : f32
    %26 = vector.broadcast %cst_11 : f32 to vector<16x1xf32>
    %27 = arith.addf %23, %26 : vector<16x1xf32>
    %28 = math.rsqrt %27 : vector<16x1xf32>
    %29 = vector.broadcast %28 : vector<16x1xf32> to vector<16x32xf32>
    %30 = arith.mulf %25, %29 : vector<16x32xf32>
    %31 = vector.broadcast %11 : vector<1x32xf32> to vector<16x32xf32>
    %32 = arith.mulf %30, %31 : vector<16x32xf32>
    %33 = vector.broadcast %12 : vector<1x32xf32> to vector<16x32xf32>
    %34 = arith.addf %32, %33 : vector<16x32xf32>
    %c0_12 = arith.constant 0 : index
    %c0_13 = arith.constant 0 : index
    %35 = vector.load %arg2[%c0_12, %c0_13] : memref<16x16xf32, #tpu.memory_space<vmem>>, vector<16x16xf32>
    %c0_14 = arith.constant 0 : index
    %c0_15 = arith.constant 0 : index
    %c0_16 = arith.constant 0 : index
    %36 = vector.load %arg12[%c0_14, %c0_15, %c0_16] : memref<2x6x32xf32, #tpu.memory_space<vmem>>, vector<1x6x32xf32>
    %37 = vector.shape_cast %36 : vector<1x6x32xf32> to vector<6x32xf32>
    %38 = arith.truncf %34 : vector<16x32xf32> to vector<16x32xbf16>
    %c0_17 = arith.constant 0 : index
    %c0_18 = arith.constant 0 : index
    %c0_19 = arith.constant 0 : index
    %39 = vector.load %arg6[%c0_17, %c0_18, %c0_19] : memref<2x32x96xbf16, #tpu.memory_space<vmem>>, vector<1x32x96xbf16>
    %40 = vector.shape_cast %39 : vector<1x32x96xbf16> to vector<32x96xbf16>
    %cst_20 = arith.constant dense<0.000000e+00> : vector<16x96xf32>
    %41 = tpu.matmul %38, %40, %cst_20 {dimension_numbers = #tpu.dot_dimension_numbers<[1], [0], [0], [1], [0, 0, 1, 1], [], []>} : vector<16x32xbf16>, vector<32x96xbf16>, vector<16x96xf32> -> vector<16x96xf32>
    %c0_21 = arith.constant 0 : index
    %c0_22 = arith.constant 0 : index
    %c0_23 = arith.constant 0 : index
    %42 = vector.load %arg7[%c0_21, %c0_22, %c0_23] : memref<2x1x96xf32, #tpu.memory_space<vmem>>, vector<1x1x96xf32>
    %43 = vector.shape_cast %42 : vector<1x1x96xf32> to vector<1x96xf32>
    %44 = vector.broadcast %43 : vector<1x96xf32> to vector<16x96xf32>
    %45 = arith.addf %41, %44 : vector<16x96xf32>
    %46 = vector.extract_strided_slice %45 {offsets = [0, 0], sizes = [16, 16], strides = [1, 1]} : vector<16x96xf32> to vector<16x16xf32>
    %47 = vector.extract_strided_slice %45 {offsets = [0, 32], sizes = [16, 16], strides = [1, 1]} : vector<16x96xf32> to vector<16x16xf32>
    %48 = vector.extract_strided_slice %45 {offsets = [0, 64], sizes = [16, 16], strides = [1, 1]} : vector<16x96xf32> to vector<16x16xf32>
    %cst_24 = arith.constant dense<0.000000e+00> : vector<16x16xf32>
    %49 = tpu.matmul %46, %47, %cst_24 {dimension_numbers = #tpu.dot_dimension_numbers<[1], [1], [0], [0], [0, 0, 1, 0], [], []>} : vector<16x16xf32>, vector<16x16xf32>, vector<16x16xf32> -> vector<16x16xf32>
    %cst_25 = arith.constant 2.500000e-01 : f32
    %50 = vector.broadcast %cst_25 : f32 to vector<16x16xf32>
    %51 = arith.mulf %49, %50 : vector<16x16xf32>
    %52 = arith.addf %51, %35 : vector<16x16xf32>
    %cst_26 = arith.constant dense<0xFF800000> : vector<16xf32>
    %53 = vector.multi_reduction <maximumf>, %52, %cst_26 [1] : vector<16x16xf32> to vector<16xf32>
    %54 = vector.shape_cast %53 : vector<16xf32> to vector<16x1xf32>
    %55 = vector.broadcast %54 : vector<16x1xf32> to vector<16x16xf32>
    %56 = arith.subf %52, %55 : vector<16x16xf32>
    %57 = math.exp %56 : vector<16x16xf32>
    %cst_27 = arith.constant dense<0.000000e+00> : vector<16xf32>
    %58 = vector.multi_reduction <add>, %57, %cst_27 [1] : vector<16x16xf32> to vector<16xf32>
    %59 = vector.shape_cast %58 : vector<16xf32> to vector<16x1xf32>
    %60 = tpu.reciprocal %59 {approx = true} : vector<16x1xf32> -> vector<16x1xf32>
    %61 = vector.broadcast %60 : vector<16x1xf32> to vector<16x16xf32>
    %62 = arith.mulf %57, %61 : vector<16x16xf32>
    %cst_28 = arith.constant dense<0.000000e+00> : vector<16x16xf32>
    %63 = tpu.matmul %62, %48, %cst_28 {dimension_numbers = #tpu.dot_dimension_numbers<[1], [0], [0], [1], [0, 0, 1, 1], [], []>} : vector<16x16xf32>, vector<16x16xf32>, vector<16x16xf32> -> vector<16x16xf32>
    %64 = vector.extract_strided_slice %45 {offsets = [0, 16], sizes = [16, 16], strides = [1, 1]} : vector<16x96xf32> to vector<16x16xf32>
    %65 = vector.extract_strided_slice %45 {offsets = [0, 48], sizes = [16, 16], strides = [1, 1]} : vector<16x96xf32> to vector<16x16xf32>
    %66 = vector.extract_strided_slice %45 {offsets = [0, 80], sizes = [16, 16], strides = [1, 1]} : vector<16x96xf32> to vector<16x16xf32>
    %cst_29 = arith.constant dense<0.000000e+00> : vector<16x16xf32>
    %67 = tpu.matmul %64, %65, %cst_29 {dimension_numbers = #tpu.dot_dimension_numbers<[1], [1], [0], [0], [0, 0, 1, 0], [], []>} : vector<16x16xf32>, vector<16x16xf32>, vector<16x16xf32> -> vector<16x16xf32>
    %cst_30 = arith.constant 2.500000e-01 : f32
    %68 = vector.broadcast %cst_30 : f32 to vector<16x16xf32>
    %69 = arith.mulf %67, %68 : vector<16x16xf32>
    %70 = arith.addf %69, %35 : vector<16x16xf32>
    %cst_31 = arith.constant dense<0xFF800000> : vector<16xf32>
    %71 = vector.multi_reduction <maximumf>, %70, %cst_31 [1] : vector<16x16xf32> to vector<16xf32>
    %72 = vector.shape_cast %71 : vector<16xf32> to vector<16x1xf32>
    %73 = vector.broadcast %72 : vector<16x1xf32> to vector<16x16xf32>
    %74 = arith.subf %70, %73 : vector<16x16xf32>
    %75 = math.exp %74 : vector<16x16xf32>
    %cst_32 = arith.constant dense<0.000000e+00> : vector<16xf32>
    %76 = vector.multi_reduction <add>, %75, %cst_32 [1] : vector<16x16xf32> to vector<16xf32>
    %77 = vector.shape_cast %76 : vector<16xf32> to vector<16x1xf32>
    %78 = tpu.reciprocal %77 {approx = true} : vector<16x1xf32> -> vector<16x1xf32>
    %79 = vector.broadcast %78 : vector<16x1xf32> to vector<16x16xf32>
    %80 = arith.mulf %75, %79 : vector<16x16xf32>
    %cst_33 = arith.constant dense<0.000000e+00> : vector<16x16xf32>
    %81 = tpu.matmul %80, %66, %cst_33 {dimension_numbers = #tpu.dot_dimension_numbers<[1], [0], [0], [1], [0, 0, 1, 1], [], []>} : vector<16x16xf32>, vector<16x16xf32>, vector<16x16xf32> -> vector<16x16xf32>
    %82 = tpu.concatenate %63, %81 in 1 : vector<16x16xf32>, vector<16x16xf32> -> vector<16x32xf32>
    %83 = arith.truncf %82 : vector<16x32xf32> to vector<16x32xbf16>
    %c0_34 = arith.constant 0 : index
    %c0_35 = arith.constant 0 : index
    %c0_36 = arith.constant 0 : index
    %84 = vector.load %arg8[%c0_34, %c0_35, %c0_36] : memref<2x32x32xbf16, #tpu.memory_space<vmem>>, vector<1x32x32xbf16>
    %85 = vector.shape_cast %84 : vector<1x32x32xbf16> to vector<32x32xbf16>
    %cst_37 = arith.constant dense<0.000000e+00> : vector<16x32xf32>
    %86 = tpu.matmul %83, %85, %cst_37 {dimension_numbers = #tpu.dot_dimension_numbers<[1], [0], [0], [1], [0, 0, 1, 1], [], []>} : vector<16x32xbf16>, vector<32x32xbf16>, vector<16x32xf32> -> vector<16x32xf32>
    %87 = vector.extract_strided_slice %37 {offsets = [0, 0], sizes = [1, 32], strides = [1, 1]} : vector<6x32xf32> to vector<1x32xf32>
    %88 = vector.broadcast %87 : vector<1x32xf32> to vector<16x32xf32>
    %89 = arith.addf %86, %88 : vector<16x32xf32>
    %90 = arith.addf %34, %89 : vector<16x32xf32>
    %91 = vector.extract_strided_slice %37 {offsets = [1, 0], sizes = [1, 32], strides = [1, 1]} : vector<6x32xf32> to vector<1x32xf32>
    %92 = vector.extract_strided_slice %37 {offsets = [2, 0], sizes = [1, 32], strides = [1, 1]} : vector<6x32xf32> to vector<1x32xf32>
    %cst_38 = arith.constant dense<0.000000e+00> : vector<16xf32>
    %93 = vector.multi_reduction <add>, %90, %cst_38 [1] : vector<16x32xf32> to vector<16xf32>
    %94 = vector.shape_cast %93 : vector<16xf32> to vector<16x1xf32>
    %cst_39 = arith.constant 3.200000e+01 : f32
    %95 = vector.broadcast %cst_39 : f32 to vector<16x1xf32>
    %96 = arith.divf %94, %95 : vector<16x1xf32>
    %97 = vector.broadcast %96 : vector<16x1xf32> to vector<16x32xf32>
    %98 = arith.subf %90, %97 : vector<16x32xf32>
    %99 = arith.mulf %98, %98 : vector<16x32xf32>
    %cst_40 = arith.constant dense<0.000000e+00> : vector<16xf32>
    %100 = vector.multi_reduction <add>, %99, %cst_40 [1] : vector<16x32xf32> to vector<16xf32>
    %101 = vector.shape_cast %100 : vector<16xf32> to vector<16x1xf32>
    %cst_41 = arith.constant 3.200000e+01 : f32
    %102 = vector.broadcast %cst_41 : f32 to vector<16x1xf32>
    %103 = arith.divf %101, %102 : vector<16x1xf32>
    %104 = vector.broadcast %96 : vector<16x1xf32> to vector<16x32xf32>
    %105 = arith.subf %90, %104 : vector<16x32xf32>
    %cst_42 = arith.constant 9.99999996E-13 : f32
    %106 = vector.broadcast %cst_42 : f32 to vector<16x1xf32>
    %107 = arith.addf %103, %106 : vector<16x1xf32>
    %108 = math.rsqrt %107 : vector<16x1xf32>
    %109 = vector.broadcast %108 : vector<16x1xf32> to vector<16x32xf32>
    %110 = arith.mulf %105, %109 : vector<16x32xf32>
    %111 = vector.broadcast %91 : vector<1x32xf32> to vector<16x32xf32>
    %112 = arith.mulf %110, %111 : vector<16x32xf32>
    %113 = vector.broadcast %92 : vector<1x32xf32> to vector<16x32xf32>
    %114 = arith.addf %112, %113 : vector<16x32xf32>
    %115 = arith.truncf %114 : vector<16x32xf32> to vector<16x32xbf16>
    %c0_43 = arith.constant 0 : index
    %c0_44 = arith.constant 0 : index
    %c0_45 = arith.constant 0 : index
    %116 = vector.load %arg9[%c0_43, %c0_44, %c0_45] : memref<2x32x64xbf16, #tpu.memory_space<vmem>>, vector<1x32x64xbf16>
    %117 = vector.shape_cast %116 : vector<1x32x64xbf16> to vector<32x64xbf16>
    %cst_46 = arith.constant dense<0.000000e+00> : vector<16x64xf32>
    %118 = tpu.matmul %115, %117, %cst_46 {dimension_numbers = #tpu.dot_dimension_numbers<[1], [0], [0], [1], [0, 0, 1, 1], [], []>} : vector<16x32xbf16>, vector<32x64xbf16>, vector<16x64xf32> -> vector<16x64xf32>
    %c0_47 = arith.constant 0 : index
    %c0_48 = arith.constant 0 : index
    %c0_49 = arith.constant 0 : index
    %119 = vector.load %arg10[%c0_47, %c0_48, %c0_49] : memref<2x1x64xf32, #tpu.memory_space<vmem>>, vector<1x1x64xf32>
    %120 = vector.shape_cast %119 : vector<1x1x64xf32> to vector<1x64xf32>
    %121 = vector.broadcast %120 : vector<1x64xf32> to vector<16x64xf32>
    %122 = arith.addf %118, %121 : vector<16x64xf32>
    %123 = arith.mulf %122, %122 : vector<16x64xf32>
    %124 = arith.mulf %122, %123 : vector<16x64xf32>
    %cst_50 = arith.constant 4.471500e-02 : f32
    %125 = vector.broadcast %cst_50 : f32 to vector<16x64xf32>
    %126 = arith.mulf %125, %124 : vector<16x64xf32>
    %127 = arith.addf %122, %126 : vector<16x64xf32>
    %cst_51 = arith.constant 0.797884583 : f32
    %128 = vector.broadcast %cst_51 : f32 to vector<16x64xf32>
    %129 = arith.mulf %128, %127 : vector<16x64xf32>
    %130 = math.tanh %129 : vector<16x64xf32>
    %cst_52 = arith.constant 1.000000e+00 : f32
    %131 = vector.broadcast %cst_52 : f32 to vector<16x64xf32>
    %132 = arith.addf %131, %130 : vector<16x64xf32>
    %cst_53 = arith.constant 5.000000e-01 : f32
    %133 = vector.broadcast %cst_53 : f32 to vector<16x64xf32>
    %134 = arith.mulf %133, %132 : vector<16x64xf32>
    %135 = arith.mulf %122, %134 : vector<16x64xf32>
    %136 = arith.truncf %135 : vector<16x64xf32> to vector<16x64xbf16>
    %c0_54 = arith.constant 0 : index
    %c0_55 = arith.constant 0 : index
    %c0_56 = arith.constant 0 : index
    %137 = vector.load %arg11[%c0_54, %c0_55, %c0_56] : memref<2x64x32xbf16, #tpu.memory_space<vmem>>, vector<1x64x32xbf16>
    %138 = vector.shape_cast %137 : vector<1x64x32xbf16> to vector<64x32xbf16>
    %cst_57 = arith.constant dense<0.000000e+00> : vector<16x32xf32>
    %139 = tpu.matmul %136, %138, %cst_57 {dimension_numbers = #tpu.dot_dimension_numbers<[1], [0], [0], [1], [0, 0, 1, 1], [], []>} : vector<16x64xbf16>, vector<64x32xbf16>, vector<16x32xf32> -> vector<16x32xf32>
    %140 = vector.extract_strided_slice %37 {offsets = [3, 0], sizes = [1, 32], strides = [1, 1]} : vector<6x32xf32> to vector<1x32xf32>
    %141 = vector.broadcast %140 : vector<1x32xf32> to vector<16x32xf32>
    %142 = arith.addf %139, %141 : vector<16x32xf32>
    %143 = arith.addf %114, %142 : vector<16x32xf32>
    %144 = vector.extract_strided_slice %37 {offsets = [4, 0], sizes = [1, 32], strides = [1, 1]} : vector<6x32xf32> to vector<1x32xf32>
    %145 = vector.extract_strided_slice %37 {offsets = [5, 0], sizes = [1, 32], strides = [1, 1]} : vector<6x32xf32> to vector<1x32xf32>
    %cst_58 = arith.constant dense<0.000000e+00> : vector<16xf32>
    %146 = vector.multi_reduction <add>, %143, %cst_58 [1] : vector<16x32xf32> to vector<16xf32>
    %147 = vector.shape_cast %146 : vector<16xf32> to vector<16x1xf32>
    %cst_59 = arith.constant 3.200000e+01 : f32
    %148 = vector.broadcast %cst_59 : f32 to vector<16x1xf32>
    %149 = arith.divf %147, %148 : vector<16x1xf32>
    %150 = vector.broadcast %149 : vector<16x1xf32> to vector<16x32xf32>
    %151 = arith.subf %143, %150 : vector<16x32xf32>
    %152 = arith.mulf %151, %151 : vector<16x32xf32>
    %cst_60 = arith.constant dense<0.000000e+00> : vector<16xf32>
    %153 = vector.multi_reduction <add>, %152, %cst_60 [1] : vector<16x32xf32> to vector<16xf32>
    %154 = vector.shape_cast %153 : vector<16xf32> to vector<16x1xf32>
    %cst_61 = arith.constant 3.200000e+01 : f32
    %155 = vector.broadcast %cst_61 : f32 to vector<16x1xf32>
    %156 = arith.divf %154, %155 : vector<16x1xf32>
    %157 = vector.broadcast %149 : vector<16x1xf32> to vector<16x32xf32>
    %158 = arith.subf %143, %157 : vector<16x32xf32>
    %cst_62 = arith.constant 9.99999996E-13 : f32
    %159 = vector.broadcast %cst_62 : f32 to vector<16x1xf32>
    %160 = arith.addf %156, %159 : vector<16x1xf32>
    %161 = math.rsqrt %160 : vector<16x1xf32>
    %162 = vector.broadcast %161 : vector<16x1xf32> to vector<16x32xf32>
    %163 = arith.mulf %158, %162 : vector<16x32xf32>
    %164 = vector.broadcast %144 : vector<1x32xf32> to vector<16x32xf32>
    %165 = arith.mulf %163, %164 : vector<16x32xf32>
    %166 = vector.broadcast %145 : vector<1x32xf32> to vector<16x32xf32>
    %167 = arith.addf %165, %166 : vector<16x32xf32>
    %c1 = arith.constant 1 : index
    %c0_63 = arith.constant 0 : index
    %c0_64 = arith.constant 0 : index
    %168 = vector.load %arg12[%c1, %c0_63, %c0_64] : memref<2x6x32xf32, #tpu.memory_space<vmem>>, vector<1x6x32xf32>
    %169 = vector.shape_cast %168 : vector<1x6x32xf32> to vector<6x32xf32>
    %170 = arith.truncf %167 : vector<16x32xf32> to vector<16x32xbf16>
    %c1_65 = arith.constant 1 : index
    %c0_66 = arith.constant 0 : index
    %c0_67 = arith.constant 0 : index
    %171 = vector.load %arg6[%c1_65, %c0_66, %c0_67] : memref<2x32x96xbf16, #tpu.memory_space<vmem>>, vector<1x32x96xbf16>
    %172 = vector.shape_cast %171 : vector<1x32x96xbf16> to vector<32x96xbf16>
    %cst_68 = arith.constant dense<0.000000e+00> : vector<16x96xf32>
    %173 = tpu.matmul %170, %172, %cst_68 {dimension_numbers = #tpu.dot_dimension_numbers<[1], [0], [0], [1], [0, 0, 1, 1], [], []>} : vector<16x32xbf16>, vector<32x96xbf16>, vector<16x96xf32> -> vector<16x96xf32>
    %c1_69 = arith.constant 1 : index
    %c0_70 = arith.constant 0 : index
    %c0_71 = arith.constant 0 : index
    %174 = vector.load %arg7[%c1_69, %c0_70, %c0_71] : memref<2x1x96xf32, #tpu.memory_space<vmem>>, vector<1x1x96xf32>
    %175 = vector.shape_cast %174 : vector<1x1x96xf32> to vector<1x96xf32>
    %176 = vector.broadcast %175 : vector<1x96xf32> to vector<16x96xf32>
    %177 = arith.addf %173, %176 : vector<16x96xf32>
    %178 = vector.extract_strided_slice %177 {offsets = [0, 0], sizes = [16, 16], strides = [1, 1]} : vector<16x96xf32> to vector<16x16xf32>
    %179 = vector.extract_strided_slice %177 {offsets = [0, 32], sizes = [16, 16], strides = [1, 1]} : vector<16x96xf32> to vector<16x16xf32>
    %180 = vector.extract_strided_slice %177 {offsets = [0, 64], sizes = [16, 16], strides = [1, 1]} : vector<16x96xf32> to vector<16x16xf32>
    %cst_72 = arith.constant dense<0.000000e+00> : vector<16x16xf32>
    %181 = tpu.matmul %178, %179, %cst_72 {dimension_numbers = #tpu.dot_dimension_numbers<[1], [1], [0], [0], [0, 0, 1, 0], [], []>} : vector<16x16xf32>, vector<16x16xf32>, vector<16x16xf32> -> vector<16x16xf32>
    %cst_73 = arith.constant 2.500000e-01 : f32
    %182 = vector.broadcast %cst_73 : f32 to vector<16x16xf32>
    %183 = arith.mulf %181, %182 : vector<16x16xf32>
    %184 = arith.addf %183, %35 : vector<16x16xf32>
    %cst_74 = arith.constant dense<0xFF800000> : vector<16xf32>
    %185 = vector.multi_reduction <maximumf>, %184, %cst_74 [1] : vector<16x16xf32> to vector<16xf32>
    %186 = vector.shape_cast %185 : vector<16xf32> to vector<16x1xf32>
    %187 = vector.broadcast %186 : vector<16x1xf32> to vector<16x16xf32>
    %188 = arith.subf %184, %187 : vector<16x16xf32>
    %189 = math.exp %188 : vector<16x16xf32>
    %cst_75 = arith.constant dense<0.000000e+00> : vector<16xf32>
    %190 = vector.multi_reduction <add>, %189, %cst_75 [1] : vector<16x16xf32> to vector<16xf32>
    %191 = vector.shape_cast %190 : vector<16xf32> to vector<16x1xf32>
    %192 = tpu.reciprocal %191 {approx = true} : vector<16x1xf32> -> vector<16x1xf32>
    %193 = vector.broadcast %192 : vector<16x1xf32> to vector<16x16xf32>
    %194 = arith.mulf %189, %193 : vector<16x16xf32>
    %cst_76 = arith.constant dense<0.000000e+00> : vector<16x16xf32>
    %195 = tpu.matmul %194, %180, %cst_76 {dimension_numbers = #tpu.dot_dimension_numbers<[1], [0], [0], [1], [0, 0, 1, 1], [], []>} : vector<16x16xf32>, vector<16x16xf32>, vector<16x16xf32> -> vector<16x16xf32>
    %196 = vector.extract_strided_slice %177 {offsets = [0, 16], sizes = [16, 16], strides = [1, 1]} : vector<16x96xf32> to vector<16x16xf32>
    %197 = vector.extract_strided_slice %177 {offsets = [0, 48], sizes = [16, 16], strides = [1, 1]} : vector<16x96xf32> to vector<16x16xf32>
    %198 = vector.extract_strided_slice %177 {offsets = [0, 80], sizes = [16, 16], strides = [1, 1]} : vector<16x96xf32> to vector<16x16xf32>
    %cst_77 = arith.constant dense<0.000000e+00> : vector<16x16xf32>
    %199 = tpu.matmul %196, %197, %cst_77 {dimension_numbers = #tpu.dot_dimension_numbers<[1], [1], [0], [0], [0, 0, 1, 0], [], []>} : vector<16x16xf32>, vector<16x16xf32>, vector<16x16xf32> -> vector<16x16xf32>
    %cst_78 = arith.constant 2.500000e-01 : f32
    %200 = vector.broadcast %cst_78 : f32 to vector<16x16xf32>
    %201 = arith.mulf %199, %200 : vector<16x16xf32>
    %202 = arith.addf %201, %35 : vector<16x16xf32>
    %cst_79 = arith.constant dense<0xFF800000> : vector<16xf32>
    %203 = vector.multi_reduction <maximumf>, %202, %cst_79 [1] : vector<16x16xf32> to vector<16xf32>
    %204 = vector.shape_cast %203 : vector<16xf32> to vector<16x1xf32>
    %205 = vector.broadcast %204 : vector<16x1xf32> to vector<16x16xf32>
    %206 = arith.subf %202, %205 : vector<16x16xf32>
    %207 = math.exp %206 : vector<16x16xf32>
    %cst_80 = arith.constant dense<0.000000e+00> : vector<16xf32>
    %208 = vector.multi_reduction <add>, %207, %cst_80 [1] : vector<16x16xf32> to vector<16xf32>
    %209 = vector.shape_cast %208 : vector<16xf32> to vector<16x1xf32>
    %210 = tpu.reciprocal %209 {approx = true} : vector<16x1xf32> -> vector<16x1xf32>
    %211 = vector.broadcast %210 : vector<16x1xf32> to vector<16x16xf32>
    %212 = arith.mulf %207, %211 : vector<16x16xf32>
    %cst_81 = arith.constant dense<0.000000e+00> : vector<16x16xf32>
    %213 = tpu.matmul %212, %198, %cst_81 {dimension_numbers = #tpu.dot_dimension_numbers<[1], [0], [0], [1], [0, 0, 1, 1], [], []>} : vector<16x16xf32>, vector<16x16xf32>, vector<16x16xf32> -> vector<16x16xf32>
    %214 = tpu.concatenate %195, %213 in 1 : vector<16x16xf32>, vector<16x16xf32> -> vector<16x32xf32>
    %215 = arith.truncf %214 : vector<16x32xf32> to vector<16x32xbf16>
    %c1_82 = arith.constant 1 : index
    %c0_83 = arith.constant 0 : index
    %c0_84 = arith.constant 0 : index
    %216 = vector.load %arg8[%c1_82, %c0_83, %c0_84] : memref<2x32x32xbf16, #tpu.memory_space<vmem>>, vector<1x32x32xbf16>
    %217 = vector.shape_cast %216 : vector<1x32x32xbf16> to vector<32x32xbf16>
    %cst_85 = arith.constant dense<0.000000e+00> : vector<16x32xf32>
    %218 = tpu.matmul %215, %217, %cst_85 {dimension_numbers = #tpu.dot_dimension_numbers<[1], [0], [0], [1], [0, 0, 1, 1], [], []>} : vector<16x32xbf16>, vector<32x32xbf16>, vector<16x32xf32> -> vector<16x32xf32>
    %219 = vector.extract_strided_slice %169 {offsets = [0, 0], sizes = [1, 32], strides = [1, 1]} : vector<6x32xf32> to vector<1x32xf32>
    %220 = vector.broadcast %219 : vector<1x32xf32> to vector<16x32xf32>
    %221 = arith.addf %218, %220 : vector<16x32xf32>
    %222 = arith.addf %167, %221 : vector<16x32xf32>
    %223 = vector.extract_strided_slice %169 {offsets = [1, 0], sizes = [1, 32], strides = [1, 1]} : vector<6x32xf32> to vector<1x32xf32>
    %224 = vector.extract_strided_slice %169 {offsets = [2, 0], sizes = [1, 32], strides = [1, 1]} : vector<6x32xf32> to vector<1x32xf32>
    %cst_86 = arith.constant dense<0.000000e+00> : vector<16xf32>
    %225 = vector.multi_reduction <add>, %222, %cst_86 [1] : vector<16x32xf32> to vector<16xf32>
    %226 = vector.shape_cast %225 : vector<16xf32> to vector<16x1xf32>
    %cst_87 = arith.constant 3.200000e+01 : f32
    %227 = vector.broadcast %cst_87 : f32 to vector<16x1xf32>
    %228 = arith.divf %226, %227 : vector<16x1xf32>
    %229 = vector.broadcast %228 : vector<16x1xf32> to vector<16x32xf32>
    %230 = arith.subf %222, %229 : vector<16x32xf32>
    %231 = arith.mulf %230, %230 : vector<16x32xf32>
    %cst_88 = arith.constant dense<0.000000e+00> : vector<16xf32>
    %232 = vector.multi_reduction <add>, %231, %cst_88 [1] : vector<16x32xf32> to vector<16xf32>
    %233 = vector.shape_cast %232 : vector<16xf32> to vector<16x1xf32>
    %cst_89 = arith.constant 3.200000e+01 : f32
    %234 = vector.broadcast %cst_89 : f32 to vector<16x1xf32>
    %235 = arith.divf %233, %234 : vector<16x1xf32>
    %236 = vector.broadcast %228 : vector<16x1xf32> to vector<16x32xf32>
    %237 = arith.subf %222, %236 : vector<16x32xf32>
    %cst_90 = arith.constant 9.99999996E-13 : f32
    %238 = vector.broadcast %cst_90 : f32 to vector<16x1xf32>
    %239 = arith.addf %235, %238 : vector<16x1xf32>
    %240 = math.rsqrt %239 : vector<16x1xf32>
    %241 = vector.broadcast %240 : vector<16x1xf32> to vector<16x32xf32>
    %242 = arith.mulf %237, %241 : vector<16x32xf32>
    %243 = vector.broadcast %223 : vector<1x32xf32> to vector<16x32xf32>
    %244 = arith.mulf %242, %243 : vector<16x32xf32>
    %245 = vector.broadcast %224 : vector<1x32xf32> to vector<16x32xf32>
    %246 = arith.addf %244, %245 : vector<16x32xf32>
    %247 = arith.truncf %246 : vector<16x32xf32> to vector<16x32xbf16>
    %c1_91 = arith.constant 1 : index
    %c0_92 = arith.constant 0 : index
    %c0_93 = arith.constant 0 : index
    %248 = vector.load %arg9[%c1_91, %c0_92, %c0_93] : memref<2x32x64xbf16, #tpu.memory_space<vmem>>, vector<1x32x64xbf16>
    %249 = vector.shape_cast %248 : vector<1x32x64xbf16> to vector<32x64xbf16>
    %cst_94 = arith.constant dense<0.000000e+00> : vector<16x64xf32>
    %250 = tpu.matmul %247, %249, %cst_94 {dimension_numbers = #tpu.dot_dimension_numbers<[1], [0], [0], [1], [0, 0, 1, 1], [], []>} : vector<16x32xbf16>, vector<32x64xbf16>, vector<16x64xf32> -> vector<16x64xf32>
    %c1_95 = arith.constant 1 : index
    %c0_96 = arith.constant 0 : index
    %c0_97 = arith.constant 0 : index
    %251 = vector.load %arg10[%c1_95, %c0_96, %c0_97] : memref<2x1x64xf32, #tpu.memory_space<vmem>>, vector<1x1x64xf32>
    %252 = vector.shape_cast %251 : vector<1x1x64xf32> to vector<1x64xf32>
    %253 = vector.broadcast %252 : vector<1x64xf32> to vector<16x64xf32>
    %254 = arith.addf %250, %253 : vector<16x64xf32>
    %255 = arith.mulf %254, %254 : vector<16x64xf32>
    %256 = arith.mulf %254, %255 : vector<16x64xf32>
    %cst_98 = arith.constant 4.471500e-02 : f32
    %257 = vector.broadcast %cst_98 : f32 to vector<16x64xf32>
    %258 = arith.mulf %257, %256 : vector<16x64xf32>
    %259 = arith.addf %254, %258 : vector<16x64xf32>
    %cst_99 = arith.constant 0.797884583 : f32
    %260 = vector.broadcast %cst_99 : f32 to vector<16x64xf32>
    %261 = arith.mulf %260, %259 : vector<16x64xf32>
    %262 = math.tanh %261 : vector<16x64xf32>
    %cst_100 = arith.constant 1.000000e+00 : f32
    %263 = vector.broadcast %cst_100 : f32 to vector<16x64xf32>
    %264 = arith.addf %263, %262 : vector<16x64xf32>
    %cst_101 = arith.constant 5.000000e-01 : f32
    %265 = vector.broadcast %cst_101 : f32 to vector<16x64xf32>
    %266 = arith.mulf %265, %264 : vector<16x64xf32>
    %267 = arith.mulf %254, %266 : vector<16x64xf32>
    %268 = arith.truncf %267 : vector<16x64xf32> to vector<16x64xbf16>
    %c1_102 = arith.constant 1 : index
    %c0_103 = arith.constant 0 : index
    %c0_104 = arith.constant 0 : index
    %269 = vector.load %arg11[%c1_102, %c0_103, %c0_104] : memref<2x64x32xbf16, #tpu.memory_space<vmem>>, vector<1x64x32xbf16>
    %270 = vector.shape_cast %269 : vector<1x64x32xbf16> to vector<64x32xbf16>
    %cst_105 = arith.constant dense<0.000000e+00> : vector<16x32xf32>
    %271 = tpu.matmul %268, %270, %cst_105 {dimension_numbers = #tpu.dot_dimension_numbers<[1], [0], [0], [1], [0, 0, 1, 1], [], []>} : vector<16x64xbf16>, vector<64x32xbf16>, vector<16x32xf32> -> vector<16x32xf32>
    %272 = vector.extract_strided_slice %169 {offsets = [3, 0], sizes = [1, 32], strides = [1, 1]} : vector<6x32xf32> to vector<1x32xf32>
    %273 = vector.broadcast %272 : vector<1x32xf32> to vector<16x32xf32>
    %274 = arith.addf %271, %273 : vector<16x32xf32>
    %275 = arith.addf %246, %274 : vector<16x32xf32>
    %276 = vector.extract_strided_slice %169 {offsets = [4, 0], sizes = [1, 32], strides = [1, 1]} : vector<6x32xf32> to vector<1x32xf32>
    %277 = vector.extract_strided_slice %169 {offsets = [5, 0], sizes = [1, 32], strides = [1, 1]} : vector<6x32xf32> to vector<1x32xf32>
    %cst_106 = arith.constant dense<0.000000e+00> : vector<16xf32>
    %278 = vector.multi_reduction <add>, %275, %cst_106 [1] : vector<16x32xf32> to vector<16xf32>
    %279 = vector.shape_cast %278 : vector<16xf32> to vector<16x1xf32>
    %cst_107 = arith.constant 3.200000e+01 : f32
    %280 = vector.broadcast %cst_107 : f32 to vector<16x1xf32>
    %281 = arith.divf %279, %280 : vector<16x1xf32>
    %282 = vector.broadcast %281 : vector<16x1xf32> to vector<16x32xf32>
    %283 = arith.subf %275, %282 : vector<16x32xf32>
    %284 = arith.mulf %283, %283 : vector<16x32xf32>
    %cst_108 = arith.constant dense<0.000000e+00> : vector<16xf32>
    %285 = vector.multi_reduction <add>, %284, %cst_108 [1] : vector<16x32xf32> to vector<16xf32>
    %286 = vector.shape_cast %285 : vector<16xf32> to vector<16x1xf32>
    %cst_109 = arith.constant 3.200000e+01 : f32
    %287 = vector.broadcast %cst_109 : f32 to vector<16x1xf32>
    %288 = arith.divf %286, %287 : vector<16x1xf32>
    %289 = vector.broadcast %281 : vector<16x1xf32> to vector<16x32xf32>
    %290 = arith.subf %275, %289 : vector<16x32xf32>
    %cst_110 = arith.constant 9.99999996E-13 : f32
    %291 = vector.broadcast %cst_110 : f32 to vector<16x1xf32>
    %292 = arith.addf %288, %291 : vector<16x1xf32>
    %293 = math.rsqrt %292 : vector<16x1xf32>
    %294 = vector.broadcast %293 : vector<16x1xf32> to vector<16x32xf32>
    %295 = arith.mulf %290, %294 : vector<16x32xf32>
    %296 = vector.broadcast %276 : vector<1x32xf32> to vector<16x32xf32>
    %297 = arith.mulf %295, %296 : vector<16x32xf32>
    %298 = vector.broadcast %277 : vector<1x32xf32> to vector<16x32xf32>
    %299 = arith.addf %297, %298 : vector<16x32xf32>
    %300 = vector.extract_strided_slice %299 {offsets = [0, 0], sizes = [1, 32], strides = [1, 1]} : vector<16x32xf32> to vector<1x32xf32>
    %301 = vector.extract_strided_slice %299 {offsets = [8, 0], sizes = [1, 32], strides = [1, 1]} : vector<16x32xf32> to vector<1x32xf32>
    %302 = tpu.concatenate %300, %301 in 0 : vector<1x32xf32>, vector<1x32xf32> -> vector<2x32xf32>
    %303 = arith.truncf %302 : vector<2x32xf32> to vector<2x32xbf16>
    %c0_111 = arith.constant 0 : index
    %c0_112 = arith.constant 0 : index
    %304 = vector.load %arg3[%c0_111, %c0_112] : memref<2x32xf32, #tpu.memory_space<vmem>>, vector<2x32xf32>
    %305 = arith.truncf %304 : vector<2x32xf32> to vector<2x32xbf16>
    %c0_113 = arith.constant 0 : index
    %c0_114 = arith.constant 0 : index
    %306 = vector.load %arg13[%c0_113, %c0_114] : memref<32x1024xbf16, #tpu.memory_space<vmem>>, vector<32x1024xbf16>
    %cst_115 = arith.constant dense<0.000000e+00> : vector<2x1024xf32>
    %307 = tpu.matmul %303, %306, %cst_115 {dimension_numbers = #tpu.dot_dimension_numbers<[1], [0], [0], [1], [0, 0, 1, 1], [], []>} : vector<2x32xbf16>, vector<32x1024xbf16>, vector<2x1024xf32> -> vector<2x1024xf32>
    %c0_116 = arith.constant 0 : index
    %c0_117 = arith.constant 0 : index
    %308 = vector.load %arg14[%c0_116, %c0_117] : memref<32x1024xbf16, #tpu.memory_space<vmem>>, vector<32x1024xbf16>
    %cst_118 = arith.constant dense<0.000000e+00> : vector<2x1024xf32>
    %309 = tpu.matmul %305, %308, %cst_118 {dimension_numbers = #tpu.dot_dimension_numbers<[1], [0], [0], [1], [0, 0, 1, 1], [], []>} : vector<2x32xbf16>, vector<32x1024xbf16>, vector<2x1024xf32> -> vector<2x1024xf32>
    %310 = arith.addf %307, %309 : vector<2x1024xf32>
    %c0_119 = arith.constant 0 : index
    %c0_120 = arith.constant 0 : index
    %311 = vector.load %arg15[%c0_119, %c0_120] : memref<1x1024xf32, #tpu.memory_space<vmem>>, vector<1x1024xf32>
    %312 = vector.broadcast %311 : vector<1x1024xf32> to vector<2x1024xf32>
    %313 = arith.addf %310, %312 : vector<2x1024xf32>
    %cst_121 = arith.constant 0.000000e+00 : f32
    %314 = vector.broadcast %cst_121 : f32 to vector<2x1024xf32>
    %315 = arith.maximumf %313, %314 : vector<2x1024xf32>
    %316 = arith.truncf %315 : vector<2x1024xf32> to vector<2x1024xbf16>
    %c0_122 = arith.constant 0 : index
    %c0_123 = arith.constant 0 : index
    %317 = vector.load %arg16[%c0_122, %c0_123] : memref<1024x256xbf16, #tpu.memory_space<vmem>>, vector<1024x256xbf16>
    %cst_124 = arith.constant dense<0.000000e+00> : vector<2x256xf32>
    %318 = tpu.matmul %316, %317, %cst_124 {dimension_numbers = #tpu.dot_dimension_numbers<[1], [0], [0], [1], [0, 0, 1, 1], [], []>} : vector<2x1024xbf16>, vector<1024x256xbf16>, vector<2x256xf32> -> vector<2x256xf32>
    %c0_125 = arith.constant 0 : index
    %c0_126 = arith.constant 0 : index
    %319 = vector.load %arg17[%c0_125, %c0_126] : memref<1x256xf32, #tpu.memory_space<vmem>>, vector<1x256xf32>
    %320 = vector.broadcast %319 : vector<1x256xf32> to vector<2x256xf32>
    %321 = arith.addf %318, %320 : vector<2x256xf32>
    %cst_127 = arith.constant 0.000000e+00 : f32
    %322 = vector.broadcast %cst_127 : f32 to vector<2x256xf32>
    %323 = arith.maximumf %321, %322 : vector<2x256xf32>
    %c0_128 = arith.constant 0 : index
    %c0_129 = arith.constant 0 : index
    %324 = vector.load %arg18[%c0_128, %c0_129] : memref<256x1xf32, #tpu.memory_space<vmem>>, vector<256x1xf32>
    %cst_130 = arith.constant dense<0.000000e+00> : vector<2x1xf32>
    %325 = tpu.matmul %323, %324, %cst_130 {dimension_numbers = #tpu.dot_dimension_numbers<[1], [0], [0], [1], [0, 0, 1, 1], [], []>} : vector<2x256xf32>, vector<256x1xf32>, vector<2x1xf32> -> vector<2x1xf32>
    %c0_131 = arith.constant 0 : index
    %c0_132 = arith.constant 0 : index
    %326 = vector.load %arg19[%c0_131, %c0_132] : memref<1x1xf32, #tpu.memory_space<vmem>>, vector<1x1xf32>
    %327 = vector.broadcast %326 : vector<1x1xf32> to vector<2x1xf32>
    %328 = arith.addf %325, %327 : vector<2x1xf32>
    %329 = arith.negf %328 : vector<2x1xf32>
    %330 = math.exp %329 : vector<2x1xf32>
    %cst_133 = arith.constant 1.000000e+00 : f32
    %331 = vector.broadcast %cst_133 : f32 to vector<2x1xf32>
    %332 = arith.addf %331, %330 : vector<2x1xf32>
    %333 = arith.divf %331, %332 : vector<2x1xf32>
    %c0_134 = arith.constant 0 : index
    %c0_135 = arith.constant 0 : index
    %334 = vector.load %arg20[%c0_134, %c0_135] : memref<2x1xf32, #tpu.memory_space<vmem>>, vector<2x1xf32>
    tpu.vector_store %arg20[%c0_134, %c0_135], %333 {strides = array<i32>} : memref<2x1xf32, #tpu.memory_space<vmem>>, vector<2x1xf32>,
    return
  }
}

</mosaic_0001>

<bundles_post_ra>
// kernel: epitope_bert_mhc_forward.1
= control target key start
LH: loop header
LB: loop body
LE: loop exit
PB: predicated region body
PF: predicated region fallthrough
CT: control target
= control target key end

     0   :  { %s5179_s0 = inlined_call_operand.vmem [shape: s32[16,1], index: 0, kind: input, shape index: {}]   ;;  %s5180_s1 = inlined_call_operand.vmem [shape: f32[16,32], index: 1, kind: input, shape index: {}]   ;;  %s5181_s2 = inlined_call_operand.vmem [shape: f32[16,16], index: 2, kind: input, shape index: {}]   ;;  %s5182_s3 = inlined_call_operand.vmem [shape: f32[2,32], index: 3, kind: input, shape index: {}]   ;;  %s5183_s4 = inlined_call_operand.vmem [shape: f32[32,32], index: 4, kind: input, shape index: {}]   ;;  %s5184_s5 = inlined_call_operand.vmem [shape: f32[2,32], index: 5, kind: input, shape index: {}]   ;;  %s5185_s6 = inlined_call_operand.vmem [shape: bf16[2,32,96], index: 6, kind: input, shape index: {}]   ;;  %s5186_s7 = inlined_call_operand.vmem [shape: f32[2,1,96], index: 7, kind: input, shape index: {}]   ;;  %s5187_s8 = inlined_call_operand.vmem [shape: bf16[2,32,32], index: 8, kind: input, shape index: {}]   ;;  %s5188_s9 = inlined_call_operand.vmem [shape: bf16[2,32,64], index: 9, kind: input, shape index: {}]   ;;  %s5189_s10 = inlined_call_operand.vmem [shape: f32[2,1,64], index: 10, kind: input, shape index: {}]   ;;  %s5190_s11 = inlined_call_operand.vmem [shape: bf16[2,64,32], index: 11, kind: input, shape index: {}]   ;;  %s5191_s12 = inlined_call_operand.vmem [shape: f32[2,6,32], index: 12, kind: input, shape index: {}]   ;;  %s5192_s13 = inlined_call_operand.vmem [shape: bf16[32,1024], index: 13, kind: input, shape index: {}]   ;;  %s5193_s14 = inlined_call_operand.vmem [shape: bf16[32,1024], index: 14, kind: input, shape index: {}]   ;;  %s5194_s15 = inlined_call_operand.vmem [shape: f32[1,1024], index: 15, kind: input, shape index: {}]   ;;  %s5195_s16 = inlined_call_operand.hbm [shape: bf16[1024,256], index: 16, kind: input, shape index: {}]   ;;  %s5196_s17 = inlined_call_operand.vmem [shape: f32[1,256], index: 17, kind: input, shape index: {}]   ;;  %s5197_s18 = inlined_call_operand.vmem [shape: f32[256,1], index: 18, kind: input, shape index: {}]   ;;  %s5198_s19 = inlined_call_operand.<no memory space> [shape: f32[1,1], index: 19, kind: input, shape index: {}]   ;;  %s5199_s20 = inlined_call_operand.vmem [shape: f32[2,1], index: 20, kind: output, shape index: {}]  }
   0x1   :  { %5204 = sst [smem:[#allocation6_spill]] %s5179_s0  ;;  %v25_v0 = vstv %s5198_s19 }
   0x2   :  { %5205 = sst [smem:[#allocation7_spill]] %s5180_s1  ;;  %26 = vst [vmem:[#allocation2] sm:$0x1] %v25_v0 }
   0x3   :  { %5206 = sst [smem:[#allocation8_spill]] %s5181_s2 }
   0x4   :  { %5207 = sst [smem:[#allocation9_spill]] %s5182_s3 }
   0x5   :  { %5208 = sst [smem:[#allocation10_spill]] %s5183_s4 }
   0x6   :  { %27 = vsyncpa [#allocation4], 0  ;;  %s4447_s23 = smov [#allocation3]   ;;  %s4423_s3 = scalar_lea.hbm %s5195_s16, 16384 }
   0x7   :  { %s65_s24 = sshll.u32 %s4447_s23, 4  ;;  %p4424_p0 = scmp.ne.s32.totalorder %s5195_s16, %s4423_s3  ;;  %s66_s24 = int_to_ptr.vmem [resolvable:$true] %s65_s24 }
   0x8   :  { %p4427_p1 = scmp.lt.u32.totalorder %s4423_s3, %s5195_s16 }
   0xa   :  { %p4429_p2 = pnand %p4427_p1, %p4424_p0 }
   0xc   :  { %4432 = shalt.err (!%p4429_p2)
}
   0xd   :  { %s4433_s19 = scalar_lea.vmem %s66_s24, 16384  ;;  %p4438_p4 = scmp.lt.s32.totalorder %s66_s24, %s66_s24 }
   0xe   :  { %p4434_p3 = scmp.ne.s32.totalorder %s66_s24, %s4433_s19  ;;  %p4439_p5 = scmp.lt.s32.totalorder %s4433_s19, %s4433_s19 }
  0x10   :  { %p4440_p6 = por %p4439_p5, %p4438_p4 }
  0x12   :  { %p4441_p7 = pnand %p4440_p6, %p4434_p3 }
  0x14   :  { %4444 = shalt.err (!%p4441_p7)
}
  0x15   :  { %s4448_s29 = smov 128   ;;  %s4449_s30 = smov 8  }
  0x16   :  { %71 = dma.hbm_to_vmem [thread:$0]  %s5195_s16, 16384, %s66_s24, [#allocation4], %s4448_s29, %s4448_s29, %s4449_s30  }
  0x17   :  { %4445 = dma.done.wait [#allocation4], 16384  }
  0x18   :  { %4446 = vsyncadd [#allocation4], 4294950912  ;;  %v4450_v1 = vmov 0   ;;  %s5209_s23 = sld [smem:[#allocation6_spill]]  ;;  %s5210_s27 = sld [smem:[#allocation10_spill]]  ;;  %v4451_v10 = vmov 0.0   ;;  %v84_v11 = vlaneseq }
  0x19   :  { %4096 = vset.pattern.permute.xlu0 %v4450_v1  ;;  %vm105_vm0 = vcmask 261120   ;;  %s5211_s21 = sld [smem:[#allocation7_spill]]  ;;  %v4147_v35 = vld [vmem:[%s5185_s6] sm:$0xff]   ;;  %v4148_v36 = vld [vmem:[%s5185_s6 + $0x8] sm:$0xff]   ;;  %vm4452_vm3 = vmmov 0   ;;  %vm303_vm4 = vcmask 130048  }
  0x1a   :  { %v85_v12 = vand.u32 127, %v84_v11  ;;  %v4622_v43 = vshrl.u32 %v84_v11, 7  ;;  %v102_v45 = vld [vmem:[%s5184_s5] sm:$0x3]  ;;  %s4453_s16 = smov 96   ;;  %s4454_s24 = smov 80   ;;  %vm4656_vm5 = vmpackc.low %vm303_vm4, %vm303_vm4 }
  0x1b   :  { %v3503_v58 = vld [vmem:[%s5186_s7] ss:$0 sm:$0xff]  ;;  %s4455_s4 = smov 112   ;;  %s5214_s30 = sld [smem:[#allocation8_spill]]  ;;  %vm942_vm6 = vcmask 523264   ;;  %vm1834_vm7 = vcmask 1040384  }
  0x1c   :  { %v4625_v44 = vsub.s32 0, %v4622_v43  ;;  %v4632_v49 = vsub.s32 1, %v4622_v43  ;;  %s4456_s1 = smov 48   ;;  %s4457_s22 = smov 64   ;;  %vm3492_vm8 = vcmask 1024  }
  0x1d   :  { %s4458_s26 = smov 16  }
  0x1e   :  { %v82_v2 = vld [vmem:[%s5209_s23] sm:$0xff]  ;;  %v83_v3 = vld [vmem:[%s5209_s23 + $0x8] sm:$0xff]  ;;  %v100_v6 = vld [vmem:[%s5210_s27 + $0x10] sm:$0xff]  ;;  %v217_v47 = vrot.slane %v102_v45, %v4625_v44  ;;  %v223_v53 = vrot.slane %v102_v45, %v4632_v49 }
  0x1f   :  { %v98_v4 = vld [vmem:[%s5210_s27] sm:$0xff]  ;;  %87 = vperm.xlu0 %4096, %v82_v2   ;;  %v99_v5 = vld [vmem:[%s5210_s27 + $0x8] sm:$0xff]  ;;  %v101_v7 = vld [vmem:[%s5210_s27 + $0x18] sm:$0xff] }
  0x20   :  { %v3992_v8 = vpack.c.bf16 %v99_v5, %v98_v4  ;;  %v3996_v9 = vpack.c.bf16 %v101_v7, %v100_v6  ;;  %v103_v17 = vld [vmem:[%s5211_s21] sm:$0xff]  ;;  %v104_v19 = vld [vmem:[%s5211_s21 + $0x8] sm:$0xff] }
  0x22   :  { %3993 = vmatprep.subr.bf16.mxu1 %v3992_v8 }
  0x23   :  { %90 = vperm.xlu0 %4096, %v83_v3   ;;  %3995 = vmatpush3.bf16.msra.mxu1 %v3992_v8 }
  0x24   :  { %3997 = vmatprep.subr.bf16.mxu1 %v3996_v9 }
  0x27   :  { %3999 = vmatpush3.bf16.msra.mxu1 %v3996_v9 }
  0x28   :  { %3864 = vmatprep.subr.bf16.mxu1 %v4451_v10 }
  0x9e   :  { %v88_v13 = vpop.permute.xlu0 %87 }
  0x9f   :  { %vm92_vm1 = vcmp.eq.s32.totalorder %v85_v12, %v88_v13 }
  0xa0   :  { %v3499_v14 = vsel %vm92_vm1, 1.0, %v4451_v10 }
  0xa1   :  { %3861 = vmatprep.mubr.msk.f32.mxu1 %vm105_vm0, %v3499_v14 }
  0xa2   :  { %v91_v15 = vpop.permute.xlu0 %90 }
  0xa3   :  { %vm93_vm2 = vcmp.eq.s32.totalorder %v85_v12, %v91_v15 }
  0xa4   :  { %v3500_v16 = vsel %vm93_vm2, 1.0, %v4451_v10 }
  0xa5   :  { %3862 = vmatmul.mubr.msk.f32.vlgmr.msra.gmra.mrb[0].mxu1 %vm105_vm0, %v3500_v16  ;;  %v4677_v16 = vld [vmem:[%s5214_s30 + $0x8] sm:$0xff] }
  0xa6   :  { %3865 = vmatpush3.bf16.msra.mxu1 %v4147_v35  ;;  %3868 = vmatprep.mubr.msk.bf16.mxu1 %vm4452_vm3, %v4451_v10 }
  0xa7   :  { %3866 = vmatprep.subr.bf16.mxu1 %v4451_v10 }
  0xaa   :  { %3867 = vmatpush3.bf16.msra.mxu1 %v4148_v36 }
 0x178   :  { %v3863_v18 = vpop.f32.mrb[0].mxu1 }
 0x179   :  { %v178_v20 = vpop.f32.mrb[1].mxu1  ;;  %v184_v22 = vadd.f32 %v3863_v18, %v104_v19  ;;  %v4682_v19 = vld [vmem:[%s5214_s30] sm:$0xff] }
 0x17a   :  { %v179_v21 = vadd.f32 %v178_v20, %v103_v17 }
 0x17b   :  { %v190_v24 = vsel %vm105_vm0, %v184_v22, 0.0 }
 0x17c   :  { %v187_v23 = vsel %vm105_vm0, %v179_v21, 0.0 }
 0x17d   :  { %188 = vadd.xlane.f32.xlu1 %v187_v23 }
 0x181   :  { %191 = vadd.xlane.f32.xlu1 %v190_v24 }
 0x20a   :  { %v189_v25 = vpop.xlane.xlu1 %188 }
 0x20b   :  { %v194_v26 = vmul.f32 0.03125, %v189_v25 }
 0x20d   :  { %v196_v27 = vsub.f32 %v179_v21, %v194_v26 }
 0x20e   :  { %v192_v28 = vpop.xlane.xlu1 %191 }
 0x20f   :  { %v195_v29 = vmul.f32 0.03125, %v192_v28  ;;  %v198_v30 = vmul.f32 %v196_v27, %v196_v27 }
 0x211   :  { %v197_v31 = vsub.f32 %v184_v22, %v195_v29  ;;  %v200_v32 = vsel %vm105_vm0, %v198_v30, 0.0 }
 0x212   :  { %201 = vadd.xlane.f32.xlu0 %v200_v32 }
 0x213   :  { %v199_v33 = vmul.f32 %v197_v31, %v197_v31 }
 0x215   :  { %v203_v34 = vsel %vm105_vm0, %v199_v33, 0.0 }
 0x216   :  { %204 = vadd.xlane.f32.xlu1 %v203_v34 }
 0x29f   :  { %v202_v37 = vpop.xlane.xlu0 %201 }
 0x2a0   :  { %v206_v38 = vmul.f32 0.03125, %v202_v37 }
 0x2a2   :  { %v208_v39 = vadd.f32 1e-12, %v206_v38 }
 0x2a3   :  { %v205_v40 = vpop.xlane.xlu1 %204 }
 0x2a4   :  { %4359 = vrsqrt.f32 %v208_v39  ;;  %v207_v41 = vmul.f32 0.03125, %v205_v40 }
 0x2a6   :  { %v209_v42 = vadd.f32 1e-12, %v207_v41 }
 0x2a8   :  { %4361 = vrsqrt.f32 %v209_v42 }
 0x2ae   :  { %v4360_v46 = vpop.eup %4359 }
 0x2af   :  { %v212_v48 = vmul.f32 %v4360_v46, %v196_v27 }
 0x2b1   :  { %v218_v51 = vmul.f32 %v217_v47, %v212_v48 }
 0x2b2   :  { %v4362_v50 = vpop.eup %4361 }
 0x2b3   :  { %v213_v52 = vmul.f32 %v4362_v50, %v197_v31  ;;  %v4635_v55 = vadd.f32 %v223_v53, %v218_v51 }
 0x2b5   :  { %v219_v54 = vmul.f32 %v217_v47, %v213_v52 }
 0x2b7   :  { %v4637_v56 = vadd.f32 %v223_v53, %v219_v54 }
 0x2b9   :  { %v229_v57 = vpack.c.bf16 %v4637_v56, %v4635_v55 }
 0x2bb   :  { %3869 = vmatmul.mubr.msk.bf16.vlgmr.msra.gmra.mrb[4].mxu1 %vm105_vm0, %v229_v57 }
 0x38e   :  { %v290_v59 = vpop.f32.mrb[4].mxu1 }
 0x38f   :  { %v291_v60 = vadd.f32 %v3503_v58, %v290_v59  ;;  %v3870_v61 = vpop.f32.mrb[5].mxu1 }
 0x390   :  { %v293_v62 = vpop.f32.mrb[6].mxu1 }
 0x391   :  { %v294_v63 = vadd.f32 %v3503_v58, %v293_v62  ;;  %v3871_v0 = vpop.f32.mrb[7].mxu1  ;;  %3876 = vmatprep.mubr.msk.f32.mxu1 %vm303_vm4, %v291_v60 }
 0x393   :  { %v4646_v2 = vpack.i.bf16 %v294_v63, %v291_v60 }
 0x395   :  { %4098 = vrot.lane.b32.xlu1 %v4646_v2, %s4453_s16 }
 0x399   :  { %4103 = vrot.lane.b32.xlu1 %v4646_v2, %s4454_s24 }
 0x39d   :  { %500 = vrot.lane.b32.xlu1 %v291_v60, %s4455_s4 }
 0x3a1   :  { %502 = vrot.lane.b32.xlu1 %v294_v63, %s4455_s4 }
 0x407   :  { %v4099_v3 = vpop.permute.xlu1 %4098 }
 0x408   :  { %v4101_v4 = vunpack.i.h.bf16 %v4099_v3  ;;  %v4100_v5 = vunpack.i.l.bf16 %v4099_v3 }
 0x40a   :  { %v4000_v7 = vpack.c.bf16 %v4101_v4, %v4100_v5 }
 0x40b   :  { %v4104_v8 = vpop.permute.xlu1 %4103 }
 0x40c   :  { %v4106_v9 = vunpack.i.h.bf16 %v4104_v8  ;;  %v4105_v11 = vunpack.i.l.bf16 %v4104_v8  ;;  %4002 = vmatprep.subr.msk.bf16.mxu1 %vm4656_vm5, %v4000_v7 }
 0x40d   :  { %4005 = vmatpush3.bf16.xpose.msk.msra.mxu1 %vm4656_vm5, %v4000_v7 }
 0x40e   :  { %v4010_v12 = vpack.c.bf16 %v4106_v9, %v4105_v11 }
 0x40f   :  { %v501_v13 = vpop.permute.xlu1 %500 }
 0x410   :  { %4012 = vmatprep.subr.msk.bf16.mxu0 %vm4656_vm5, %v4010_v12  ;;  %3890 = vmatprep.mubr.msk.f32.mxu0 %vm303_vm4, %v501_v13 }
 0x411   :  { %4015 = vmatpush3.bf16.xpose.msk.msra.mxu0 %vm4656_vm5, %v4010_v12 }
 0x412   :  { %3908 = vmatprep.subr.bf16.mxu0 %v4451_v10 }
 0x413   :  { %v503_v14 = vpop.permute.xlu1 %502 }
 0x414   :  { %3877 = vmatmul.mubr.msk.f32.vlgmr.msra.gmra.mrb[2].mxu1 %vm303_vm4, %v294_v63 }
 0x418   :  { %3891 = vmatmul.mubr.msk.f32.vlgmr.msra.gmra.mrb[0].mxu0 %vm303_vm4, %v503_v14 }
 0x419   :  { %3912 = vmatprep.mubr.msk.bf16.mxu0 %vm4452_vm3, %v4451_v10 }
 0x4e7   :  { %v3878_v15 = vpop.f32.mrb[2].mxu1 }
 0x4e8   :  { %v388_v17 = vmul.f32 0.25, %v3878_v15  ;;  %v378_v18 = vpop.f32.mrb[3].mxu1 }
 0x4e9   :  { %v387_v20 = vmul.f32 0.25, %v378_v18  ;;  %v4149_v18 = vld [vmem:[%s5187_s8] sm:$0xff]  }
 0x4ea   :  { %v390_v21 = vadd.f32 %v388_v17, %v4677_v16 }
 0x4eb   :  { %v3892_v22 = vpop.f32.mrb[0].mxu0  ;;  %v389_v23 = vadd.f32 %v387_v20, %v4682_v19  ;;  %v4150_v20 = vld [vmem:[%s5187_s8 + $0x8] sm:$0xff]  }
 0x4ec   :  { %v582_v24 = vpop.f32.mrb[1].mxu0  ;;  %v394_v25 = vsel %vm303_vm4, %v390_v21, -inf  ;;  %v592_v26 = vmul.f32 0.25, %v3892_v22 }
 0x4ed   :  { %v591_v27 = vmul.f32 0.25, %v582_v24  ;;  %395 = vmax.xlane.f32.xlu1 %v394_v25  ;;  %v391_v28 = vsel %vm303_vm4, %v389_v23, -inf }
 0x4ee   :  { %392 = vmax.xlane.f32.xlu0 %v391_v28  ;;  %v594_v31 = vadd.f32 %v592_v26, %v4677_v16 }
 0x4ef   :  { %v593_v29 = vadd.f32 %v591_v27, %v4682_v19 }
 0x4f0   :  { %v598_v32 = vsel %vm303_vm4, %v594_v31, -inf }
 0x4f1   :  { %v595_v30 = vsel %vm303_vm4, %v593_v29, -inf }
 0x4f2   :  { %596 = vmax.xlane.f32.xlu0 %v595_v30 }
 0x4f6   :  { %599 = vmax.xlane.f32.xlu0 %v598_v32  ;;  %v4724_v32 = vld [vmem:[%s5191_s12] sm:$0x3f] }
 0x4fe   :  { %4113 = vrot.lane.b32.xlu1 %v4646_v2, %s4456_s1 }
 0x57a   :  { %v396_v33 = vpop.xlane.xlu1 %395 }
 0x57b   :  { %v398_v34 = vsub.f32 %v390_v21, %v396_v33  ;;  %v393_v35 = vpop.xlane.xlu0 %392  ;;  %v722_v33 = vrot.slane %v4724_v32, %v4625_v44 }
 0x57c   :  { %v397_v38 = vsub.f32 %v389_v23, %v393_v35 }
 0x57d   :  { %v401_v36 = vmul.f32 1.442695, %v398_v34 }
 0x57e   :  { %v399_v41 = vmul.f32 1.442695, %v397_v38  ;;  %v4114_v62 = vpop.permute.xlu1 %4113 }
 0x57f   :  { %4363 = vpow2.f32 %v401_v36  ;;  %v597_v37 = vpop.xlane.xlu0 %596  ;;  %v4116_v0 = vunpack.i.h.bf16 %v4114_v62  ;;  %v4115_v3 = vunpack.i.l.bf16 %v4114_v62 }
 0x580   :  { %v601_v42 = vsub.f32 %v593_v29, %v597_v37 }
 0x581   :  { %v4016_v12 = vpack.c.bf16 %v4116_v0, %v4115_v3 }
 0x582   :  { %v603_v47 = vmul.f32 1.442695, %v601_v42 }
 0x583   :  { %v600_v39 = vpop.xlane.xlu0 %599 }
 0x584   :  { %v602_v40 = vsub.f32 %v594_v31, %v600_v39 }
 0x586   :  { %v605_v45 = vmul.f32 1.442695, %v602_v40 }
 0x588   :  { %4365 = vpow2.f32 %v605_v45 }
 0x589   :  { %v4364_v46 = vpop.eup %4363  ;;  %4367 = vpow2.f32 %v399_v41 }
 0x58a   :  { %v406_v48 = vsel %vm303_vm4, %v4364_v46, 0.0  ;;  %4369 = vpow2.f32 %v603_v47 }
 0x58b   :  { %407 = vadd.xlane.f32.xlu0 %v406_v48 }
 0x592   :  { %v4366_v50 = vpop.eup %4365 }
 0x593   :  { %v610_v51 = vsel %vm303_vm4, %v4366_v50, 0.0  ;;  %v4368_v52 = vpop.eup %4367 }
 0x594   :  { %611 = vadd.xlane.f32.xlu0 %v610_v51  ;;  %v403_v53 = vsel %vm303_vm4, %v4368_v52, 0.0  ;;  %v4370_v54 = vpop.eup %4369 }
 0x595   :  { %v607_v57 = vsel %vm303_vm4, %v4370_v54, 0.0 }
 0x598   :  { %404 = vadd.xlane.f32.xlu0 %v403_v53 }
 0x59c   :  { %608 = vadd.xlane.f32.xlu0 %v607_v57 }
 0x5b2   :  { %4108 = vrot.lane.b32.xlu0 %v4646_v2, %s4457_s22 }
 0x618   :  { %v408_v58 = vpop.xlane.xlu0 %407 }
 0x621   :  { %v612_v59 = vpop.xlane.xlu0 %611 }
 0x625   :  { %v405_v60 = vpop.xlane.xlu0 %404 }
 0x626   :  { %4371 = vrcp.f32 %v405_v60 }
 0x627   :  { %4373 = vrcp.f32 %v408_v58  ;;  %v4152_v58 = vld [vmem:[%s5188_s9 + $0x8] sm:$0xff]  }
 0x629   :  { %v609_v61 = vpop.xlane.xlu0 %608 }
 0x62a   :  { %4375 = vrcp.f32 %v609_v61 }
 0x62b   :  { %4377 = vrcp.f32 %v612_v59 }
 0x62d   :  { %v4109_v63 = vpop.permute.xlu0 %4108 }
 0x62e   :  { %v4111_v4 = vunpack.i.h.bf16 %v4109_v63  ;;  %v4110_v5 = vunpack.i.l.bf16 %v4109_v63 }
 0x630   :  { %v4372_v7 = vpop.eup %4371  ;;  %v4006_v8 = vpack.c.bf16 %v4111_v4, %v4110_v5  ;;  %v810_v4 = vrot.slane %v4724_v32, %v4632_v49 }
 0x631   :  { %v4374_v9 = vpop.eup %4373  ;;  %v411_v11 = vmul.f32 %v4372_v7, %v4368_v52  ;;  %v4745_v7 = vsub.s32 2, %v4622_v43 }
 0x632   :  { %4007 = vmatprep.subr.bf16.mxu1 %v4006_v8  ;;  %v412_v13 = vmul.f32 %v4374_v9, %v4364_v46 }
 0x633   :  { %4009 = vmatpush3.bf16.msra.mxu1 %v4006_v8  ;;  %3883 = vmatprep.mubr.msk.f32.mxu1 %vm303_vm4, %v411_v11 }
 0x634   :  { %v4376_v2 = vpop.eup %4375  ;;  %4017 = vmatprep.subr.bf16.mxu1 %v4016_v12 }
 0x635   :  { %v4378_v14 = vpop.eup %4377  ;;  %v615_v15 = vmul.f32 %v4376_v2, %v4370_v54 }
 0x636   :  { %3884 = vmatmul.mubr.msk.f32.vlgmr.msra.gmra.mrb[8].mxu1 %vm303_vm4, %v412_v13  ;;  %v616_v17 = vmul.f32 %v4378_v14, %v4366_v50 }
 0x637   :  { %4019 = vmatpush3.bf16.msra.mxu1 %v4016_v12  ;;  %3897 = vmatprep.mubr.msk.f32.mxu1 %vm303_vm4, %v615_v15  ;;  %v816_v12 = vrot.slane %v4724_v32, %v4745_v7 }
 0x638   :  { %3900 = vmatprep.subr.bf16.mxu1 %v4451_v10 }
 0x63a   :  { %3898 = vmatmul.mubr.msk.f32.vlgmr.msra.gmra.mrb[10].mxu1 %vm303_vm4, %v616_v17  ;;  %v4153_v17 = vld [vmem:[%s5190_s11] sm:$0xff]  }
 0x63b   :  { %3904 = vmatprep.mubr.msk.bf16.mxu1 %vm4452_vm3, %v4451_v10  ;;  %3901 = vmatpush3.bf16.msra.mxu1 %v4149_v18  ;;  %v4154_v18 = vld [vmem:[%s5190_s11 + $0x8] sm:$0xff]  }
 0x63c   :  { %3902 = vmatprep.subr.bf16.mxu1 %v4451_v10 }
 0x63f   :  { %3903 = vmatpush3.bf16.msra.mxu1 %v4150_v20  ;;  %v4155_v20 = vld [vmem:[%s5190_s11 + $0x10] sm:$0xff]  }
 0x640   :  { %3916 = vmatprep.subr.bf16.mxu1 %v4451_v10 }
 0x709   :  { %v3885_v21 = vpop.f32.mrb[8].mxu1 }
 0x70a   :  { %v491_v22 = vpop.f32.mrb[9].mxu1 }
 0x70d   :  { %v3899_v23 = vpop.f32.mrb[10].mxu1 }
 0x70e   :  { %v695_v24 = vpop.f32.mrb[11].mxu1 }
 0x70f   :  { %v4117_v25 = vpack.i.bf16 %v3899_v23, %v695_v24 }
 0x711   :  { %4118 = vrot.lane.b32.xlu0 %v4117_v25, %s4458_s26 }
 0x783   :  { %v4119_v26 = vpop.permute.xlu0 %4118 }
 0x784   :  { %v4121_v27 = vunpack.i.h.bf16 %v4119_v26  ;;  %v4120_v28 = vunpack.i.l.bf16 %v4119_v26 }
 0x786   :  { %v713_v29 = vsel %vm303_vm4, %v3885_v21, %v4121_v27  ;;  %v712_v30 = vsel %vm303_vm4, %v491_v22, %v4120_v28  ;;  %v4156_v21 = vld [vmem:[%s5190_s11 + $0x18] sm:$0xff]   ;;  %v3522_v22 = vld [vmem:[%s5189_s10] ss:$0 sm:$0xff] }
 0x787   :  { %v714_v31 = vpack.c.bf16 %v713_v29, %v712_v30 }
 0x789   :  { %3905 = vmatmul.mubr.msk.bf16.vlgmr.msra.gmra.mrb[12].mxu1 %vm105_vm0, %v714_v31 }
 0x78a   :  { %3924 = vmatprep.mubr.msk.bf16.mxu1 %vm4452_vm3, %v4451_v10  ;;  %3917 = vmatpush3.bf16.msra.mxu1 %v4153_v17 }
 0x78b   :  { %3918 = vmatprep.subr.bf16.mxu1 %v4451_v10 }
 0x78e   :  { %3919 = vmatpush3.bf16.msra.mxu1 %v4154_v18 }
 0x78f   :  { %3920 = vmatprep.subr.bf16.mxu1 %v4451_v10 }
 0x792   :  { %3921 = vmatpush3.bf16.msra.mxu1 %v4155_v20 }
 0x793   :  { %3922 = vmatprep.subr.bf16.mxu1 %v4451_v10 }
 0x796   :  { %3923 = vmatpush3.bf16.msra.mxu1 %v4156_v21 }
 0x85c   :  { %v772_v34 = vpop.f32.mrb[12].mxu1 }
 0x85d   :  { %v773_v35 = vadd.f32 %v772_v34, %v722_v33  ;;  %v3906_v36 = vpop.f32.mrb[13].mxu1 }
 0x85e   :  { %v775_v37 = vpop.f32.mrb[14].mxu1 }
 0x85f   :  { %v776_v38 = vadd.f32 %v775_v37, %v722_v33  ;;  %v3907_v39 = vpop.f32.mrb[15].mxu1  ;;  %v779_v40 = vadd.f32 %v773_v35, %v4635_v55 }
 0x861   :  { %v781_v41 = vsel %vm105_vm0, %v779_v40, 0.0  ;;  %v780_v42 = vadd.f32 %v776_v38, %v4637_v56  ;;  %v4151_v56 = vld [vmem:[%s5188_s9] sm:$0xff]  }
 0x862   :  { %782 = vadd.xlane.f32.xlu0 %v781_v41  ;;  %3909 = vmatpush3.bf16.msra.mxu0 %v4151_v56 }
 0x863   :  { %v784_v45 = vsel %vm105_vm0, %v780_v42, 0.0  ;;  %3910 = vmatprep.subr.bf16.mxu0 %v4451_v10 }
 0x864   :  { %785 = vadd.xlane.f32.xlu1 %v784_v45 }
 0x866   :  { %3911 = vmatpush3.bf16.msra.mxu0 %v4152_v58 }
 0x867   :  { %3928 = vmatprep.subr.bf16.mxu0 %v4451_v10 }
 0x8ef   :  { %v783_v46 = vpop.xlane.xlu0 %782 }
 0x8f0   :  { %v787_v47 = vmul.f32 0.03125, %v783_v46 }
 0x8f1   :  { %v786_v48 = vpop.xlane.xlu1 %785 }
 0x8f2   :  { %v789_v50 = vsub.f32 %v779_v40, %v787_v47  ;;  %v788_v51 = vmul.f32 0.03125, %v786_v48 }
 0x8f4   :  { %v790_v52 = vsub.f32 %v780_v42, %v788_v51  ;;  %v791_v53 = vmul.f32 %v789_v50, %v789_v50 }
 0x8f6   :  { %v793_v54 = vsel %vm105_vm0, %v791_v53, 0.0  ;;  %v792_v57 = vmul.f32 %v790_v52, %v790_v52 }
 0x8f7   :  { %794 = vadd.xlane.f32.xlu0 %v793_v54 }
 0x8f8   :  { %v796_v55 = vsel %vm105_vm0, %v792_v57, 0.0 }
 0x8fb   :  { %797 = vadd.xlane.f32.xlu0 %v796_v55 }
 0x984   :  { %v795_v59 = vpop.xlane.xlu0 %794 }
 0x985   :  { %v799_v60 = vmul.f32 0.03125, %v795_v59 }
 0x987   :  { %v801_v61 = vadd.f32 1e-12, %v799_v60 }
 0x988   :  { %v798_v62 = vpop.xlane.xlu0 %797 }
 0x989   :  { %4379 = vrsqrt.f32 %v801_v61  ;;  %v800_v63 = vmul.f32 0.03125, %v798_v62 }
 0x98b   :  { %v802_v0 = vadd.f32 1e-12, %v800_v63 }
 0x98d   :  { %4381 = vrsqrt.f32 %v802_v0 }
 0x993   :  { %v4380_v3 = vpop.eup %4379 }
 0x994   :  { %v805_v5 = vmul.f32 %v4380_v3, %v789_v50 }
 0x996   :  { %v811_v9 = vmul.f32 %v810_v4, %v805_v5 }
 0x997   :  { %v4382_v8 = vpop.eup %4381 }
 0x998   :  { %v806_v11 = vmul.f32 %v4382_v8, %v790_v52  ;;  %v817_v13 = vadd.f32 %v816_v12, %v811_v9  ;;  %v4772_v52 = vsub.s32 3, %v4622_v43 }
 0x99a   :  { %v812_v2 = vmul.f32 %v810_v4, %v806_v11  ;;  %v917_v53 = vrot.slane %v4724_v32, %v4772_v52 }
 0x99c   :  { %v818_v14 = vadd.f32 %v816_v12, %v812_v2 }
 0x99e   :  { %v819_v15 = vpack.c.bf16 %v818_v14, %v817_v13 }
 0x9a0   :  { %3913 = vmatmul.mubr.msk.bf16.vlgmr.msra.gmra.mrb[4].mxu0 %vm105_vm0, %v819_v15  ;;  %v4158_v15 = vld [vmem:[%s5185_s6 + $0x18] sm:$0xff]  }
 0x9a1   :  { %3932 = vmatprep.mubr.msk.bf16.mxu0 %vm4452_vm3, %v4451_v10 }
 0xa73   :  { %v880_v23 = vpop.f32.mrb[4].mxu0 }
 0xa74   :  { %v881_v24 = vadd.f32 %v3522_v22, %v880_v23  ;;  %v3914_v25 = vpop.f32.mrb[5].mxu0 }
 0xa75   :  { %v883_v26 = vpop.f32.mrb[6].mxu0 }
 0xa76   :  { %v887_v27 = vmul.f32 %v881_v24, %v881_v24  ;;  %v884_v28 = vadd.f32 %v3522_v22, %v883_v26  ;;  %v3915_v29 = vpop.f32.mrb[7].mxu0  ;;  %v4793_v26 = vsub.s32 5, %v4622_v43 }
 0xa78   :  { %v889_v30 = vmul.f32 %v887_v27, %v881_v24  ;;  %v888_v31 = vmul.f32 %v884_v28, %v884_v28 }
 0xa7a   :  { %v891_v33 = vmul.f32 0.044715, %v889_v30  ;;  %v890_v34 = vmul.f32 %v888_v31, %v884_v28 }
 0xa7c   :  { %v893_v35 = vadd.f32 %v891_v33, %v881_v24  ;;  %v892_v36 = vmul.f32 0.044715, %v890_v34  ;;  %v1024_v33 = vrot.slane %v4724_v32, %v4793_v26 }
 0xa7e   :  { %v895_v37 = vmul.f32 0.7978846, %v893_v35  ;;  %v894_v38 = vadd.f32 %v892_v36, %v884_v28 }
 0xa80   :  { %4383 = vtanh.f32 %v895_v37  ;;  %v896_v39 = vmul.f32 0.7978846, %v894_v38  ;;  %v3537_v38 = vld [vmem:[%s5186_s7 + $0x1] ss:$0 sm:$0xff] }
 0xa82   :  { %4385 = vtanh.f32 %v896_v39 }
 0xa8a   :  { %v4384_v40 = vpop.eup %4383 }
 0xa8b   :  { %v899_v41 = vadd.f32 1.0, %v4384_v40 }
 0xa8c   :  { %v4386_v42 = vpop.eup %4385 }
 0xa8d   :  { %v901_v45 = vmul.f32 0.5, %v899_v41  ;;  %v900_v46 = vadd.f32 1.0, %v4386_v42 }
 0xa8f   :  { %v902_v47 = vmul.f32 0.5, %v900_v46  ;;  %v903_v48 = vmul.f32 %v901_v45, %v881_v24  ;;  %v4788_v24 = vsub.s32 4, %v4622_v43 }
 0xa91   :  { %v904_v50 = vmul.f32 %v902_v47, %v884_v28  ;;  %v1018_v25 = vrot.slane %v4724_v32, %v4788_v24 }
 0xa93   :  { %v905_v51 = vpack.c.bf16 %v904_v50, %v903_v48 }
 0xa95   :  { %3925 = vmatmul.mubr.msk.bf16.vlgmr.msra.gmra.mrb[16].mxu1 %vm942_vm6, %v905_v51 }
 0xb68   :  { %v980_v54 = vpop.f32.mrb[16].mxu1 }
 0xb69   :  { %v981_v57 = vadd.f32 %v980_v54, %v917_v53  ;;  %v3926_v55 = vpop.f32.mrb[17].mxu1 }
 0xb6a   :  { %v983_v56 = vpop.f32.mrb[18].mxu1 }
 0xb6b   :  { %v984_v58 = vadd.f32 %v983_v56, %v917_v53  ;;  %v3927_v59 = vpop.f32.mrb[19].mxu1  ;;  %v987_v60 = vadd.f32 %v981_v57, %v817_v13 }
 0xb6d   :  { %v989_v61 = vsel %vm105_vm0, %v987_v60, 0.0  ;;  %v988_v62 = vadd.f32 %v984_v58, %v818_v14  ;;  %v4157_v14 = vld [vmem:[%s5185_s6 + $0x10] sm:$0xff]  }
 0xb6e   :  { %990 = vadd.xlane.f32.xlu1 %v989_v61  ;;  %3929 = vmatpush3.bf16.msra.mxu0 %v4157_v14 }
 0xb6f   :  { %v992_v63 = vsel %vm105_vm0, %v988_v62, 0.0  ;;  %3930 = vmatprep.subr.bf16.mxu0 %v4451_v10 }
 0xb70   :  { %993 = vadd.xlane.f32.xlu0 %v992_v63 }
 0xb72   :  { %3931 = vmatpush3.bf16.msra.mxu0 %v4158_v15 }
 0xbfb   :  { %v991_v0 = vpop.xlane.xlu1 %990 }
 0xbfc   :  { %v995_v3 = vmul.f32 0.03125, %v991_v0 }
 0xbfd   :  { %v994_v4 = vpop.xlane.xlu0 %993 }
 0xbfe   :  { %v997_v5 = vsub.f32 %v987_v60, %v995_v3  ;;  %v996_v8 = vmul.f32 0.03125, %v994_v4 }
 0xc00   :  { %v998_v9 = vsub.f32 %v988_v62, %v996_v8  ;;  %v999_v11 = vmul.f32 %v997_v5, %v997_v5 }
 0xc02   :  { %v1001_v12 = vsel %vm105_vm0, %v999_v11, 0.0  ;;  %v1000_v2 = vmul.f32 %v998_v9, %v998_v9 }
 0xc03   :  { %1002 = vadd.xlane.f32.xlu1 %v1001_v12 }
 0xc04   :  { %v1004_v13 = vsel %vm105_vm0, %v1000_v2, 0.0 }
 0xc05   :  { %1005 = vadd.xlane.f32.xlu0 %v1004_v13 }
 0xc90   :  { %v1003_v17 = vpop.xlane.xlu1 %1002 }
 0xc91   :  { %v1007_v18 = vmul.f32 0.03125, %v1003_v17 }
 0xc92   :  { %v1006_v20 = vpop.xlane.xlu0 %1005 }
 0xc93   :  { %v1009_v21 = vadd.f32 1e-12, %v1007_v18  ;;  %v1008_v22 = vmul.f32 0.03125, %v1006_v20 }
 0xc95   :  { %4387 = vrsqrt.f32 %v1009_v21  ;;  %v1010_v23 = vadd.f32 1e-12, %v1008_v22 }
 0xc97   :  { %4389 = vrsqrt.f32 %v1010_v23 }
 0xc9f   :  { %v4388_v27 = vpop.eup %4387 }
 0xca0   :  { %v1013_v28 = vmul.f32 %v4388_v27, %v997_v5 }
 0xca1   :  { %v4390_v29 = vpop.eup %4389 }
 0xca2   :  { %v1019_v30 = vmul.f32 %v1018_v25, %v1013_v28  ;;  %v1014_v31 = vmul.f32 %v4390_v29, %v998_v9 }
 0xca4   :  { %v1020_v34 = vmul.f32 %v1018_v25, %v1014_v31  ;;  %v4797_v35 = vadd.f32 %v1024_v33, %v1019_v30 }
 0xca6   :  { %v4799_v36 = vadd.f32 %v1024_v33, %v1020_v34 }
 0xca8   :  { %v1029_v37 = vpack.c.bf16 %v4799_v36, %v4797_v35 }
 0xcaa   :  { %3933 = vmatmul.mubr.msk.bf16.vlgmr.msra.gmra.mrb[8].mxu0 %vm105_vm0, %v1029_v37 }
 0xd7d   :  { %v1092_v39 = vpop.f32.mrb[8].mxu0 }
 0xd7e   :  { %v1093_v40 = vadd.f32 %v3537_v38, %v1092_v39  ;;  %v3934_v41 = vpop.f32.mrb[9].mxu0 }
 0xd7f   :  { %v1095_v42 = vpop.f32.mrb[10].mxu0 }
 0xd80   :  { %v1096_v45 = vadd.f32 %v3537_v38, %v1095_v42  ;;  %v3935_v32 = vpop.f32.mrb[11].mxu0  ;;  %3940 = vmatprep.mubr.msk.f32.mxu0 %vm303_vm4, %v1093_v40 }
 0xd82   :  { %v4808_v46 = vpack.i.bf16 %v1096_v45, %v1093_v40 }
 0xd84   :  { %4128 = vrot.lane.b32.xlu0 %v4808_v46, %s4454_s24  ;;  %4123 = vrot.lane.b32.xlu1 %v4808_v46, %s4453_s16 }
 0xd88   :  { %1301 = vrot.lane.b32.xlu1 %v1093_v40, %s4455_s4 }
 0xd8c   :  { %1303 = vrot.lane.b32.xlu1 %v1096_v45, %s4455_s4 }
 0xdf6   :  { %v4129_v47 = vpop.permute.xlu0 %4128  ;;  %v4124_v48 = vpop.permute.xlu1 %4123 }
 0xdf7   :  { %v4131_v50 = vunpack.i.h.bf16 %v4129_v47  ;;  %v4130_v51 = vunpack.i.l.bf16 %v4129_v47  ;;  %v4126_v53 = vunpack.i.h.bf16 %v4124_v48  ;;  %v4125_v54 = vunpack.i.l.bf16 %v4124_v48 }
 0xdf9   :  { %v4030_v57 = vpack.c.bf16 %v4131_v50, %v4130_v51  ;;  %v4020_v55 = vpack.c.bf16 %v4126_v53, %v4125_v54 }
 0xdfa   :  { %v1302_v56 = vpop.permute.xlu1 %1301 }
 0xdfb   :  { %4022 = vmatprep.subr.msk.bf16.mxu0 %vm4656_vm5, %v4020_v55  ;;  %4032 = vmatprep.subr.msk.bf16.mxu1 %vm4656_vm5, %v4030_v57 }
 0xdfc   :  { %3954 = vmatprep.mubr.msk.f32.mxu1 %vm303_vm4, %v1302_v56  ;;  %4025 = vmatpush3.bf16.xpose.msk.msra.mxu0 %vm4656_vm5, %v4020_v55 }
 0xdfd   :  { %4035 = vmatpush3.bf16.xpose.msk.msra.mxu1 %vm4656_vm5, %v4030_v57 }
 0xdfe   :  { %3964 = vmatprep.subr.bf16.mxu1 %v4451_v10  ;;  %v1304_v58 = vpop.permute.xlu1 %1303 }
 0xe03   :  { %3941 = vmatmul.mubr.msk.f32.vlgmr.msra.gmra.mrb[2].mxu0 %vm303_vm4, %v1096_v45 }
 0xe04   :  { %3955 = vmatmul.mubr.msk.f32.vlgmr.msra.gmra.mrb[20].mxu1 %vm303_vm4, %v1304_v58 }
 0xe05   :  { %3968 = vmatprep.mubr.msk.bf16.mxu1 %vm4452_vm3, %v4451_v10 }
 0xed6   :  { %v3942_v59 = vpop.f32.mrb[2].mxu0 }
 0xed7   :  { %v1189_v60 = vmul.f32 0.25, %v3942_v59  ;;  %v3956_v61 = vpop.f32.mrb[20].mxu1  ;;  %v1179_v62 = vpop.f32.mrb[3].mxu0 }
 0xed8   :  { %v1188_v63 = vmul.f32 0.25, %v1179_v62  ;;  %v1383_v0 = vpop.f32.mrb[21].mxu1  ;;  %v1393_v8 = vmul.f32 0.25, %v3956_v61  ;;  %v4159_v62 = vld [vmem:[%s5187_s8 + $0x10] sm:$0xff]  }
 0xed9   :  { %v1392_v3 = vmul.f32 0.25, %v1383_v0  ;;  %v1191_v6 = vadd.f32 %v1189_v60, %v4677_v16  ;;  %3965 = vmatpush3.bf16.msra.mxu1 %v4159_v62  ;;  %v4164_v62 = vld [vmem:[%s5190_s11 + $0x28] sm:$0xff]  }
 0xeda   :  { %v1190_v4 = vadd.f32 %v1188_v63, %v4682_v19  ;;  %v1395_v2 = vadd.f32 %v1393_v8, %v4677_v16  ;;  %3966 = vmatprep.subr.bf16.mxu1 %v4451_v10  ;;  %v4160_v63 = vld [vmem:[%s5187_s8 + $0x18] sm:$0xff]  }
 0xedb   :  { %v1195_v5 = vsel %vm303_vm4, %v1191_v6, -inf  ;;  %v1394_v11 = vadd.f32 %v1392_v3, %v4682_v19 }
 0xedc   :  { %1196 = vmax.xlane.f32.xlu1 %v1195_v5  ;;  %v1192_v9 = vsel %vm303_vm4, %v1190_v4, -inf  ;;  %v1399_v13 = vsel %vm303_vm4, %v1395_v2, -inf }
 0xedd   :  { %1193 = vmax.xlane.f32.xlu0 %v1192_v9  ;;  %v1396_v12 = vsel %vm303_vm4, %v1394_v11, -inf  ;;  %3967 = vmatpush3.bf16.msra.mxu1 %v4160_v63  ;;  %v4165_v63 = vld [vmem:[%s5190_s11 + $0x30] sm:$0xff]  }
 0xede   :  { %3980 = vmatprep.subr.bf16.mxu1 %v4451_v10 }
 0xee1   :  { %1397 = vmax.xlane.f32.xlu0 %v1396_v12 }
 0xee5   :  { %1400 = vmax.xlane.f32.xlu0 %v1399_v13 }
 0xf69   :  { %v1197_v14 = vpop.xlane.xlu1 %1196 }
 0xf6a   :  { %v1199_v15 = vsub.f32 %v1191_v6, %v1197_v14  ;;  %v1194_v17 = vpop.xlane.xlu0 %1193  ;;  %v4870_v14 = vld [vmem:[%s5191_s12 + $0x8] sm:$0x3f] }
 0xf6b   :  { %v1198_v18 = vsub.f32 %v1190_v4, %v1194_v17 }
 0xf6c   :  { %v1202_v20 = vmul.f32 1.442695, %v1199_v15  ;;  %v1524_v15 = vrot.slane %v4870_v14, %v4625_v44 }
 0xf6d   :  { %v1200_v21 = vmul.f32 1.442695, %v1198_v18 }
 0xf6e   :  { %4391 = vpow2.f32 %v1202_v20  ;;  %v1398_v22 = vpop.xlane.xlu0 %1397 }
 0xf6f   :  { %4393 = vpow2.f32 %v1200_v21  ;;  %v1402_v23 = vsub.f32 %v1394_v11, %v1398_v22 }
 0xf71   :  { %v1404_v19 = vmul.f32 1.442695, %v1402_v23 }
 0xf72   :  { %v1401_v25 = vpop.xlane.xlu0 %1400 }
 0xf73   :  { %4395 = vpow2.f32 %v1404_v19  ;;  %v1403_v27 = vsub.f32 %v1395_v2, %v1401_v25 }
 0xf75   :  { %v1406_v28 = vmul.f32 1.442695, %v1403_v27 }
 0xf77   :  { %4397 = vpow2.f32 %v1406_v28 }
 0xf78   :  { %v4392_v16 = vpop.eup %4391 }
 0xf79   :  { %v4394_v29 = vpop.eup %4393  ;;  %v1207_v30 = vsel %vm303_vm4, %v4392_v16, 0.0 }
 0xf7a   :  { %1208 = vadd.xlane.f32.xlu0 %v1207_v30  ;;  %v1204_v31 = vsel %vm303_vm4, %v4394_v29, 0.0 }
 0xf7b   :  { %1205 = vadd.xlane.f32.xlu1 %v1204_v31 }
 0xf7d   :  { %v4396_v33 = vpop.eup %4395 }
 0xf7e   :  { %v1408_v34 = vsel %vm303_vm4, %v4396_v33, 0.0 }
 0xf7f   :  { %1409 = vadd.xlane.f32.xlu1 %v1408_v34 }
 0xf81   :  { %v4398_v37 = vpop.eup %4397 }
 0xf82   :  { %v1411_v38 = vsel %vm303_vm4, %v4398_v37, 0.0 }
 0xf83   :  { %1412 = vadd.xlane.f32.xlu0 %v1411_v38 }
 0xf90   :  { %4133 = vrot.lane.b32.xlu1 %v4808_v46, %s4457_s22 }
 0xf99   :  { %4138 = vrot.lane.b32.xlu0 %v4808_v46, %s4456_s1  ;;  %s5215_s1 = sld [smem:[#allocation9_spill]] }
0x1007   :  { %v1209_v39 = vpop.xlane.xlu0 %1208 }
0x1008   :  { %v1206_v40 = vpop.xlane.xlu1 %1205 }
0x1009   :  { %4399 = vrcp.f32 %v1206_v40  ;;  %v4162_v40 = vld [vmem:[%s5188_s9 + $0x18] sm:$0xff]  }
0x100a   :  { %4401 = vrcp.f32 %v1209_v39 }
0x100c   :  { %v1410_v41 = vpop.xlane.xlu1 %1409 }
0x100d   :  { %4403 = vrcp.f32 %v1410_v41 }
0x1010   :  { %v4134_v42 = vpop.permute.xlu1 %4133  ;;  %v1413_v45 = vpop.xlane.xlu0 %1412 }
0x1011   :  { %v4136_v32 = vunpack.i.h.bf16 %v4134_v42  ;;  %v4135_v47 = vunpack.i.l.bf16 %v4134_v42  ;;  %4405 = vrcp.f32 %v1413_v45 }
0x1013   :  { %v4400_v48 = vpop.eup %4399  ;;  %v4026_v50 = vpack.c.bf16 %v4136_v32, %v4135_v47 }
0x1014   :  { %v4402_v51 = vpop.eup %4401  ;;  %v4139_v53 = vpop.permute.xlu0 %4138  ;;  %v1212_v54 = vmul.f32 %v4400_v48, %v4394_v29 }
0x1015   :  { %v4141_v57 = vunpack.i.h.bf16 %v4139_v53  ;;  %v4140_v55 = vunpack.i.l.bf16 %v4139_v53  ;;  %4027 = vmatprep.subr.bf16.mxu0 %v4026_v50  ;;  %v1213_v56 = vmul.f32 %v4402_v51, %v4392_v16 }
0x1016   :  { %4029 = vmatpush3.bf16.msra.mxu0 %v4026_v50  ;;  %3947 = vmatprep.mubr.msk.f32.mxu0 %vm303_vm4, %v1212_v54  ;;  %v1612_v50 = vrot.slane %v4870_v14, %v4632_v49 }
0x1017   :  { %v4404_v46 = vpop.eup %4403  ;;  %v4036_v58 = vpack.c.bf16 %v4141_v57, %v4140_v55 }
0x1018   :  { %v1416_v59 = vmul.f32 %v4404_v46, %v4396_v33  ;;  %v1618_v46 = vrot.slane %v4870_v14, %v4745_v7 }
0x1019   :  { %3948 = vmatmul.mubr.msk.f32.vlgmr.msra.gmra.mrb[12].mxu0 %vm303_vm4, %v1213_v56  ;;  %4037 = vmatprep.subr.bf16.mxu0 %v4036_v58 }
0x101a   :  { %4039 = vmatpush3.bf16.msra.mxu0 %v4036_v58  ;;  %3961 = vmatprep.mubr.msk.f32.mxu0 %vm303_vm4, %v1416_v59 }
0x101b   :  { %v4406_v60 = vpop.eup %4405  ;;  %3972 = vmatprep.subr.bf16.mxu0 %v4451_v10 }
0x101c   :  { %v1417_v61 = vmul.f32 %v4406_v60, %v4398_v37 }
0x101e   :  { %3962 = vmatmul.mubr.msk.f32.vlgmr.msra.gmra.mrb[14].mxu0 %vm303_vm4, %v1417_v61  ;;  %v4163_v61 = vld [vmem:[%s5190_s11 + $0x20] sm:$0xff]  }
0x101f   :  { %3976 = vmatprep.mubr.msk.bf16.mxu0 %vm4452_vm3, %v4451_v10 }
0x10ec   :  { %v3949_v0 = vpop.f32.mrb[12].mxu0 }
0x10ed   :  { %v1292_v3 = vpop.f32.mrb[13].mxu0 }
0x10f1   :  { %v3963_v6 = vpop.f32.mrb[14].mxu0 }
0x10f2   :  { %v1496_v4 = vpop.f32.mrb[15].mxu0 }
0x10f3   :  { %v4142_v5 = vpack.i.bf16 %v3963_v6, %v1496_v4 }
0x10f5   :  { %4143 = vrot.lane.b32.xlu1 %v4142_v5, %s4458_s26 }
0x1167   :  { %v4144_v8 = vpop.permute.xlu1 %4143 }
0x1168   :  { %v4146_v9 = vunpack.i.h.bf16 %v4144_v8  ;;  %v4145_v11 = vunpack.i.l.bf16 %v4144_v8 }
0x116a   :  { %v1514_v12 = vsel %vm303_vm4, %v3949_v0, %v4146_v9  ;;  %v1513_v2 = vsel %vm303_vm4, %v1292_v3, %v4145_v11  ;;  %v4166_v0 = vld [vmem:[%s5190_s11 + $0x38] sm:$0xff]   ;;  %v3565_v3 = vld [vmem:[%s5189_s10 + $0x1] ss:$0 sm:$0xff] }
0x116b   :  { %v1515_v13 = vpack.c.bf16 %v1514_v12, %v1513_v2 }
0x116d   :  { %3969 = vmatmul.mubr.msk.bf16.vlgmr.msra.gmra.mrb[24].mxu1 %vm105_vm0, %v1515_v13 }
0x116e   :  { %3988 = vmatprep.mubr.msk.bf16.mxu1 %vm4452_vm3, %v4451_v10  ;;  %3981 = vmatpush3.bf16.msra.mxu1 %v4163_v61  ;;  %v1863_v61 = vld [vmem:[%s5193_s14 + $0x40] sm:$0xff] }
0x116f   :  { %3982 = vmatprep.subr.bf16.mxu1 %v4451_v10 }
0x1172   :  { %3983 = vmatpush3.bf16.msra.mxu1 %v4164_v62  ;;  %v1867_v62 = vld [vmem:[%s5193_s14 + $0x60] sm:$0xff] }
0x1173   :  { %3984 = vmatprep.subr.bf16.mxu1 %v4451_v10 }
0x1176   :  { %3985 = vmatpush3.bf16.msra.mxu1 %v4165_v63  ;;  %v3591_v63 = vcombine.high %v1863_v61, %v1867_v62 }
0x1177   :  { %3986 = vmatprep.subr.bf16.mxu1 %v4451_v10 }
0x117a   :  { %3987 = vmatpush3.bf16.msra.mxu1 %v4166_v0  ;;  %v3590_v0 = vcombine.low %v1863_v61, %v1867_v62 }
0x1240   :  { %v1574_v17 = vpop.f32.mrb[24].mxu1 }
0x1241   :  { %v1575_v18 = vadd.f32 %v1574_v17, %v1524_v15  ;;  %v3970_v20 = vpop.f32.mrb[25].mxu1 }
0x1242   :  { %v1577_v21 = vpop.f32.mrb[26].mxu1 }
0x1243   :  { %v1578_v22 = vadd.f32 %v1577_v21, %v1524_v15  ;;  %v3971_v23 = vpop.f32.mrb[27].mxu1  ;;  %v1581_v19 = vadd.f32 %v1575_v18, %v4797_v35 }
0x1245   :  { %v1583_v25 = vsel %vm105_vm0, %v1581_v19, 0.0  ;;  %v1582_v27 = vadd.f32 %v1578_v22, %v4799_v36  ;;  %v4161_v36 = vld [vmem:[%s5188_s9 + $0x10] sm:$0xff]  }
0x1246   :  { %1584 = vadd.xlane.f32.xlu1 %v1583_v25  ;;  %3973 = vmatpush3.bf16.msra.mxu0 %v4161_v36 }
0x1247   :  { %v1586_v28 = vsel %vm105_vm0, %v1582_v27, 0.0  ;;  %3974 = vmatprep.subr.bf16.mxu0 %v4451_v10 }
0x1248   :  { %1587 = vadd.xlane.f32.xlu0 %v1586_v28 }
0x124a   :  { %3975 = vmatpush3.bf16.msra.mxu0 %v4162_v40 }
0x12d3   :  { %v1585_v16 = vpop.xlane.xlu1 %1584 }
0x12d4   :  { %v1589_v29 = vmul.f32 0.03125, %v1585_v16 }
0x12d5   :  { %v1588_v30 = vpop.xlane.xlu0 %1587 }
0x12d6   :  { %v1591_v31 = vsub.f32 %v1581_v19, %v1589_v29  ;;  %v1590_v33 = vmul.f32 0.03125, %v1588_v30 }
0x12d8   :  { %v1592_v34 = vsub.f32 %v1582_v27, %v1590_v33  ;;  %v1593_v37 = vmul.f32 %v1591_v31, %v1591_v31  ;;  %v1722_v33 = vrot.slane %v4870_v14, %v4772_v52 }
0x12da   :  { %v1595_v38 = vsel %vm105_vm0, %v1593_v37, 0.0  ;;  %v1594_v39 = vmul.f32 %v1592_v34, %v1592_v34 }
0x12db   :  { %1596 = vadd.xlane.f32.xlu0 %v1595_v38 }
0x12dc   :  { %v1598_v35 = vsel %vm105_vm0, %v1594_v39, 0.0 }
0x12dd   :  { %1599 = vadd.xlane.f32.xlu1 %v1598_v35 }
0x1368   :  { %v1597_v41 = vpop.xlane.xlu0 %1596 }
0x1369   :  { %v1601_v42 = vmul.f32 0.03125, %v1597_v41 }
0x136a   :  { %v1600_v45 = vpop.xlane.xlu1 %1599 }
0x136b   :  { %v1603_v32 = vadd.f32 1e-12, %v1601_v42  ;;  %v1602_v47 = vmul.f32 0.03125, %v1600_v45 }
0x136d   :  { %4407 = vrsqrt.f32 %v1603_v32  ;;  %v1604_v48 = vadd.f32 1e-12, %v1602_v47  ;;  %v1855_v32 = vld [vmem:[%s5193_s14] sm:$0xff] }
0x136e   :  { %v1859_v47 = vld [vmem:[%s5193_s14 + $0x20] sm:$0xff] }
0x136f   :  { %4409 = vrsqrt.f32 %v1604_v48  ;;  %v3582_v48 = vcombine.low %v1855_v32, %v1859_v47 }
0x1377   :  { %v4408_v51 = vpop.eup %4407 }
0x1378   :  { %v1607_v53 = vmul.f32 %v4408_v51, %v1591_v31 }
0x1379   :  { %v4410_v54 = vpop.eup %4409 }
0x137a   :  { %v1613_v57 = vmul.f32 %v1612_v50, %v1607_v53  ;;  %v1608_v55 = vmul.f32 %v4410_v54, %v1592_v34 }
0x137c   :  { %v1614_v56 = vmul.f32 %v1612_v50, %v1608_v55  ;;  %v1619_v58 = vadd.f32 %v1618_v46, %v1613_v57  ;;  %v3583_v50 = vcombine.high %v1855_v32, %v1859_v47 }
0x137e   :  { %v1620_v59 = vadd.f32 %v1618_v46, %v1614_v56  ;;  %1954 = vmatprep.subr.bf16.mxu0 %v3583_v50 }
0x1380   :  { %v1621_v60 = vpack.c.bf16 %v1620_v59, %v1619_v58 }
0x1382   :  { %3977 = vmatmul.mubr.msk.bf16.vlgmr.msra.gmra.mrb[16].mxu0 %vm105_vm0, %v1621_v60 }
0x1383   :  { %1986 = vmatprep.mubr.bf16.mxu0 %v4450_v1  ;;  %1955 = vmatpush1.bf16.msra.mxu0 %v3582_v48  ;;  %v1852_v48 = vld [vmem:[%s5192_s13 + $0x68] sm:$0xff] }
0x1384   :  { %1956 = vmatprep.subr.bf16.mxu0 %v3591_v63 }
0x1387   :  { %1957 = vmatpush1.bf16.msra.mxu0 %v3590_v0 }
0x1455   :  { %v1684_v6 = vpop.f32.mrb[16].mxu0 }
0x1456   :  { %v1685_v4 = vadd.f32 %v3565_v3, %v1684_v6  ;;  %v3978_v5 = vpop.f32.mrb[17].mxu0  ;;  %v1856_v6 = vld [vmem:[%s5193_s14 + $0x8] sm:$0xff] }
0x1457   :  { %v1687_v8 = vpop.f32.mrb[18].mxu0 }
0x1458   :  { %v1691_v9 = vmul.f32 %v1685_v4, %v1685_v4  ;;  %v1688_v11 = vadd.f32 %v3565_v3, %v1687_v8  ;;  %v3979_v12 = vpop.f32.mrb[19].mxu0  ;;  %v1837_v3 = vld [vmem:[%s5215_s1] sm:$0x3] }
0x1459   :  { %v1838_v5 = vpack.c.bf16 %v1837_v3, %v1837_v3  ;;  %v1868_v12 = vld [vmem:[%s5193_s14 + $0x68] sm:$0xff] }
0x145a   :  { %v1693_v2 = vmul.f32 %v1691_v9, %v1685_v4  ;;  %v1692_v13 = vmul.f32 %v1688_v11, %v1688_v11 }
0x145b   :  { %3598 = vmatmul.mubr.msk.bf16.vlgmr.msra.gmra.mrb[20].mxu0 %vm105_vm0, %v1838_v5 }
0x145c   :  { %v1695_v15 = vmul.f32 0.044715, %v1693_v2  ;;  %v1694_v10 = vmul.f32 %v1692_v13, %v1688_v11  ;;  %2027 = vmatprep.mubr.bf16.mxu0 %v4450_v1  ;;  %v1857_v13 = vld [vmem:[%s5193_s14 + $0x10] sm:$0xff] }
0x145e   :  { %v1697_v17 = vadd.f32 %v1695_v15, %v1685_v4  ;;  %v1696_v18 = vmul.f32 0.044715, %v1694_v10  ;;  %v1861_v15 = vld [vmem:[%s5193_s14 + $0x30] sm:$0xff] }
0x1460   :  { %v1699_v20 = vmul.f32 0.7978846, %v1697_v17  ;;  %v1698_v21 = vadd.f32 %v1696_v18, %v1688_v11  ;;  %v3587_v17 = vcombine.high %v1857_v13, %v1861_v15  ;;  %v3586_v18 = vcombine.low %v1857_v13, %v1861_v15 }
0x1462   :  { %4411 = vtanh.f32 %v1699_v20  ;;  %v1700_v22 = vmul.f32 0.7978846, %v1698_v21  ;;  %2036 = vmatprep.subr.bf16.mxu1 %v3587_v17  ;;  %v1858_v20 = vld [vmem:[%s5193_s14 + $0x18] sm:$0xff]  ;;  %v1849_v17 = vld [vmem:[%s5192_s13 + $0x50] sm:$0xff] }
0x1463   :  { %v1862_v21 = vld [vmem:[%s5193_s14 + $0x38] sm:$0xff] }
0x1464   :  { %4413 = vtanh.f32 %v1700_v22  ;;  %v3589_v22 = vcombine.high %v1858_v20, %v1862_v21 }
0x146c   :  { %v4412_v23 = vpop.eup %4411 }
0x146d   :  { %v1703_v19 = vadd.f32 1.0, %v4412_v23  ;;  %v1865_v23 = vld [vmem:[%s5193_s14 + $0x50] sm:$0xff] }
0x146e   :  { %v4414_v25 = vpop.eup %4413 }
0x146f   :  { %v1705_v27 = vmul.f32 0.5, %v1703_v19  ;;  %v1704_v28 = vadd.f32 1.0, %v4414_v25  ;;  %v1869_v19 = vld [vmem:[%s5193_s14 + $0x70] sm:$0xff]  ;;  %v3588_v25 = vcombine.low %v1858_v20, %v1862_v21 }
0x1471   :  { %v1706_v16 = vmul.f32 0.5, %v1704_v28  ;;  %v1707_v29 = vmul.f32 %v1705_v27, %v1685_v4  ;;  %v1860_v4 = vld [vmem:[%s5193_s14 + $0x28] sm:$0xff]  ;;  %v3595_v27 = vcombine.high %v1865_v23, %v1869_v19  ;;  %v3594_v28 = vcombine.low %v1865_v23, %v1869_v19 }
0x1472   :  { %v3585_v8 = vcombine.high %v1856_v6, %v1860_v4  ;;  %v3584_v9 = vcombine.low %v1856_v6, %v1860_v4 }
0x1473   :  { %v1708_v30 = vmul.f32 %v1706_v16, %v1688_v11  ;;  %v1864_v11 = vld [vmem:[%s5193_s14 + $0x48] sm:$0xff]  ;;  %v1866_v16 = vld [vmem:[%s5193_s14 + $0x58] sm:$0xff] }
0x1474   :  { %1995 = vmatprep.subr.bf16.mxu0 %v3585_v8  ;;  %v3593_v2 = vcombine.high %v1864_v11, %v1868_v12  ;;  %v3592_v10 = vcombine.low %v1864_v11, %v1868_v12  ;;  %v1822_v8 = vrot.slane %v4870_v14, %v4788_v24 }
0x1475   :  { %v1709_v31 = vpack.c.bf16 %v1708_v30, %v1707_v29  ;;  %1996 = vmatpush1.bf16.msra.mxu0 %v3584_v9  ;;  %v1870_v29 = vld [vmem:[%s5193_s14 + $0x78] sm:$0xff] }
0x1476   :  { %1997 = vmatprep.subr.bf16.mxu0 %v3593_v2  ;;  %v3597_v30 = vcombine.high %v1866_v16, %v1870_v29  ;;  %v1828_v2 = vrot.slane %v4870_v14, %v4793_v26  ;;  %v1854_v14 = vld [vmem:[%s5192_s13 + $0x78] sm:$0xff] }
0x1477   :  { %3989 = vmatmul.mubr.msk.bf16.vlgmr.msra.gmra.mrb[28].mxu1 %vm942_vm6, %v1709_v31  ;;  %v3596_v31 = vcombine.low %v1866_v16, %v1870_v29  ;;  %v4178_v16 = vld [vmem:[#allocation3 + $0x204] ss:$8 sps:$4 sm:$0xff]   ;;  %v4167_v29 = vld [vmem:[#allocation3] ss:$8 sps:$4 sm:$0xff]  }
0x1478   :  { %2068 = vmatprep.mubr.bf16.mxu1 %v4450_v1  ;;  %2037 = vmatpush1.bf16.msra.mxu1 %v3586_v18 }
0x1479   :  { %1998 = vmatpush1.bf16.msra.mxu0 %v3592_v10  ;;  %2038 = vmatprep.subr.bf16.mxu1 %v3595_v27 }
0x147a   :  { %2077 = vmatprep.subr.bf16.mxu0 %v3589_v22 }
0x147c   :  { %3599 = vmatmul.mubr.msk.bf16.vlgmr.msra.gmra.mrb[24].mxu0 %vm105_vm0, %v1838_v5  ;;  %2039 = vmatpush1.bf16.msra.mxu1 %v3594_v28  ;;  %v4169_v28 = vld [vmem:[#allocation3 + $0x4] ss:$8 sps:$4 sm:$0xff]  }
0x147d   :  { %2078 = vmatpush1.bf16.msra.mxu0 %v3588_v25  ;;  %2109 = vmatprep.mubr.bf16.mxu0 %v4450_v1 }
0x147e   :  { %2079 = vmatprep.subr.bf16.mxu0 %v3597_v30  ;;  %v4176_v30 = vld [vmem:[#allocation3 + $0x200] ss:$8 sps:$4 sm:$0xff]  }
0x147f   :  { %3600 = vmatmul.mubr.msk.bf16.vlgmr.msra.gmra.mrb[32].mxu1 %vm105_vm0, %v1838_v5 }
0x1480   :  { %2233 = vmatprep.mubr.bf16.mxu1 %v4450_v1 }
0x1481   :  { %2080 = vmatpush1.bf16.msra.mxu0 %v3596_v31  ;;  %v4172_v31 = vld [vmem:[#allocation3 + $0x14] ss:$8 sps:$4 sm:$0xff]  }
0x1484   :  { %3601 = vmatmul.mubr.msk.bf16.vlgmr.msra.gmra.mrb[28].mxu0 %vm105_vm0, %v1838_v5 }
0x1485   :  { %2274 = vmatprep.mubr.bf16.mxu0 %v4450_v1 }
0x154a   :  { %v1784_v34 = vpop.f32.mrb[28].mxu1 }
0x154b   :  { %v1785_v37 = vadd.f32 %v1784_v34, %v1722_v33  ;;  %v3990_v38 = vpop.f32.mrb[29].mxu1  ;;  %v1843_v34 = vld [vmem:[%s5192_s13 + $0x20] sm:$0xff] }
0x154c   :  { %v1787_v39 = vpop.f32.mrb[30].mxu1 }
0x154d   :  { %v1788_v35 = vadd.f32 %v1787_v39, %v1722_v33  ;;  %v3991_v36 = vpop.f32.mrb[31].mxu1  ;;  %v1791_v40 = vadd.f32 %v1785_v37, %v1619_v58  ;;  %v1839_v33 = vld [vmem:[%s5192_s13] sm:$0xff]  ;;  %v1840_v37 = vld [vmem:[%s5192_s13 + $0x8] sm:$0xff] }
0x154e   :  { %v3603_v38 = vcombine.high %v1839_v33, %v1843_v34  ;;  %v1844_v39 = vld [vmem:[%s5192_s13 + $0x28] sm:$0xff] }
0x154f   :  { %v1793_v41 = vsel %vm105_vm0, %v1791_v40, 0.0  ;;  %v1792_v42 = vadd.f32 %v1788_v35, %v1620_v59  ;;  %v3602_v35 = vcombine.low %v1839_v33, %v1843_v34  ;;  %v3604_v36 = vcombine.low %v1840_v37, %v1844_v39  ;;  %v4184_v33 = vld [vmem:[#allocation3 + $0x214] ss:$8 sps:$4 sm:$0xff]   ;;  %v4170_v34 = vld [vmem:[#allocation3 + $0x10] ss:$8 sps:$4 sm:$0xff]  }
0x1550   :  { %1794 = vadd.xlane.f32.xlu1 %v1793_v41  ;;  %2201 = vmatprep.subr.bf16.mxu1 %v3603_v38  ;;  %v1847_v41 = vld [vmem:[%s5192_s13 + $0x40] sm:$0xff] }
0x1551   :  { %v1796_v45 = vsel %vm105_vm0, %v1792_v42, 0.0  ;;  %2202 = vmatpush1.bf16.msra.mxu1 %v3602_v35  ;;  %v4175_v38 = vld [vmem:[#allocation3 + $0x24] ss:$8 sps:$4 sm:$0xff]   ;;  %v4188_v35 = vld [vmem:[#allocation3 + $0x220] ss:$8 sps:$4 sm:$0xff]  }
0x1552   :  { %1797 = vadd.xlane.f32.xlu0 %v1796_v45  ;;  %v1848_v45 = vld [vmem:[%s5192_s13 + $0x48] sm:$0xff] }
0x1553   :  { %v3612_v50 = vcombine.low %v1848_v45, %v1852_v48 }
0x15dd   :  { %v1795_v51 = vpop.xlane.xlu1 %1794 }
0x15de   :  { %v1799_v53 = vmul.f32 0.03125, %v1795_v51  ;;  %v3613_v51 = vcombine.high %v1848_v45, %v1852_v48  ;;  %v4187_v45 = vld [vmem:[#allocation3 + $0x44] ss:$8 sps:$4 sm:$0xff]   ;;  %v4200_v48 = vld [vmem:[#allocation3 + $0x240] ss:$8 sps:$4 sm:$0xff]  }
0x15df   :  { %v1798_v54 = vpop.xlane.xlu0 %1797 }
0x15e0   :  { %v4923_v57 = vsub.f32 %v1791_v40, %v1799_v53  ;;  %v1800_v55 = vmul.f32 0.03125, %v1798_v54  ;;  %v3605_v40 = vcombine.high %v1840_v37, %v1844_v39  ;;  %v1841_v53 = vld [vmem:[%s5192_s13 + $0x10] sm:$0xff]  ;;  %v4173_v39 = vld [vmem:[#allocation3 + $0x20] ss:$8 sps:$4 sm:$0xff]  }
0x15e1   :  { %v1845_v54 = vld [vmem:[%s5192_s13 + $0x30] sm:$0xff] }
0x15e2   :  { %v4925_v46 = vsub.f32 %v1792_v42, %v1800_v55  ;;  %v1803_v56 = vmul.f32 %v4923_v57, %v4923_v57  ;;  %2242 = vmatprep.subr.bf16.mxu0 %v3605_v40  ;;  %v1851_v42 = vld [vmem:[%s5192_s13 + $0x60] sm:$0xff]  ;;  %v1842_v55 = vld [vmem:[%s5192_s13 + $0x18] sm:$0xff] }
0x15e3   :  { %2243 = vmatpush1.bf16.msra.mxu0 %v3604_v36  ;;  %v3610_v32 = vcombine.low %v1847_v41, %v1851_v42  ;;  %v3611_v47 = vcombine.high %v1847_v41, %v1851_v42  ;;  %v4182_v37 = vld [vmem:[#allocation3 + $0x210] ss:$8 sps:$4 sm:$0xff]   ;;  %v4181_v36 = vld [vmem:[#allocation3 + $0x34] ss:$8 sps:$4 sm:$0xff]  }
0x15e4   :  { %v1805_v58 = vsel %vm105_vm0, %v1803_v56, 0.0  ;;  %v1804_v59 = vmul.f32 %v4925_v46, %v4925_v46  ;;  %2244 = vmatprep.subr.bf16.mxu0 %v3613_v51  ;;  %v3607_v56 = vcombine.high %v1841_v53, %v1845_v54  ;;  %v4196_v40 = vld [vmem:[#allocation3 + $0x234] ss:$8 sps:$4 sm:$0xff]   ;;  %v4179_v41 = vld [vmem:[#allocation3 + $0x30] ss:$8 sps:$4 sm:$0xff]  }
0x15e5   :  { %1806 = vadd.xlane.f32.xlu1 %v1805_v58  ;;  %2203 = vmatprep.subr.bf16.mxu1 %v3611_v47  ;;  %v1846_v58 = vld [vmem:[%s5192_s13 + $0x38] sm:$0xff]  ;;  %v4185_v47 = vld [vmem:[#allocation3 + $0x40] ss:$8 sps:$4 sm:$0xff]  }
0x15e6   :  { %v1808_v60 = vsel %vm105_vm0, %v1804_v59, 0.0  ;;  %2204 = vmatpush1.bf16.msra.mxu1 %v3610_v32  ;;  %v3606_v59 = vcombine.low %v1841_v53, %v1845_v54  ;;  %v3609_v61 = vcombine.high %v1842_v55, %v1846_v58  ;;  %v4194_v42 = vld [vmem:[#allocation3 + $0x230] ss:$8 sps:$4 sm:$0xff]   ;;  %v4202_v32 = vld [vmem:[#allocation3 + $0x244] ss:$8 sps:$4 sm:$0xff]  }
0x15e7   :  { %1809 = vadd.xlane.f32.xlu0 %v1808_v60  ;;  %2245 = vmatpush1.bf16.msra.mxu0 %v3612_v50  ;;  %v3608_v60 = vcombine.low %v1842_v55, %v1846_v58  ;;  %v4193_v50 = vld [vmem:[#allocation3 + $0x54] ss:$8 sps:$4 sm:$0xff]   ;;  %v4191_v53 = vld [vmem:[#allocation3 + $0x50] ss:$8 sps:$4 sm:$0xff]   ;;  %v4199_v55 = vld [vmem:[#allocation3 + $0x64] ss:$8 sps:$4 sm:$0xff]  }
0x15e8   :  { %2283 = vmatprep.subr.bf16.mxu1 %v3607_v56  ;;  %2324 = vmatprep.subr.bf16.mxu0 %v3609_v61  ;;  %v4208_v51 = vld [vmem:[#allocation3 + $0x254] ss:$8 sps:$4 sm:$0xff]   ;;  %v4206_v54 = vld [vmem:[#allocation3 + $0x250] ss:$8 sps:$4 sm:$0xff]   ;;  %v4214_v56 = vld [vmem:[#allocation3 + $0x264] ss:$8 sps:$4 sm:$0xff]  }
0x15e9   :  { %v4197_v58 = vld [vmem:[#allocation3 + $0x60] ss:$8 sps:$4 sm:$0xff]   ;;  %v4220_v61 = vld [vmem:[#allocation3 + $0x274] ss:$8 sps:$4 sm:$0xff]  }
0x1672   :  { %v1807_v62 = vpop.xlane.xlu1 %1806 }
0x1673   :  { %v1811_v63 = vmul.f32 0.03125, %v1807_v62  ;;  %v4203_v62 = vld [vmem:[#allocation3 + $0x70] ss:$8 sps:$4 sm:$0xff]  }
0x1674   :  { %v1810_v0 = vpop.xlane.xlu0 %1809 }
0x1675   :  { %v1813_v3 = vadd.f32 1e-12, %v1811_v63  ;;  %v1812_v6 = vmul.f32 0.03125, %v1810_v0  ;;  %v4218_v63 = vld [vmem:[#allocation3 + $0x270] ss:$8 sps:$4 sm:$0xff]  }
0x1676   :  { %v4211_v0 = vld [vmem:[#allocation3 + $0x84] ss:$8 sps:$4 sm:$0xff]  }
0x1677   :  { %4415 = vrsqrt.f32 %v1813_v3  ;;  %v1814_v4 = vadd.f32 1e-12, %v1812_v6  ;;  %v4226_v3 = vld [vmem:[#allocation3 + $0x284] ss:$8 sps:$4 sm:$0xff]   ;;  %v4209_v6 = vld [vmem:[#allocation3 + $0x80] ss:$8 sps:$4 sm:$0xff]  }
0x1679   :  { %4417 = vrsqrt.f32 %v1814_v4  ;;  %v4224_v4 = vld [vmem:[#allocation3 + $0x280] ss:$8 sps:$4 sm:$0xff]  }
0x1681   :  { %v4416_v5 = vpop.eup %4415 }
0x1682   :  { %v1817_v9 = vmul.f32 %v4416_v5, %v4923_v57  ;;  %v1853_v57 = vld [vmem:[%s5192_s13 + $0x70] sm:$0xff] }
0x1683   :  { %v4418_v11 = vpop.eup %4417  ;;  %v3615_v23 = vcombine.high %v1849_v17, %v1853_v57  ;;  %v3614_v25 = vcombine.low %v1849_v17, %v1853_v57  ;;  %v4217_v5 = vld [vmem:[#allocation3 + $0x94] ss:$8 sps:$4 sm:$0xff]   ;;  %v4235_v57 = vld [vmem:[#allocation3 + $0xc4] ss:$8 sps:$4 sm:$0xff]  }
0x1684   :  { %v1818_v12 = vmul.f32 %v4418_v11, %v4925_v46  ;;  %v1823_v13 = vmul.f32 %v1822_v8, %v1817_v9  ;;  %v1850_v46 = vld [vmem:[%s5192_s13 + $0x58] sm:$0xff] }
0x1685   :  { %v3617_v19 = vcombine.high %v1850_v46, %v1854_v14  ;;  %v3616_v27 = vcombine.low %v1850_v46, %v1854_v14  ;;  %v4215_v9 = vld [vmem:[#allocation3 + $0x90] ss:$8 sps:$4 sm:$0xff]   ;;  %v4244_v17 = vld [vmem:[#allocation3 + $0x2b4] ss:$8 sps:$4 sm:$0xff]   ;;  %v4233_v46 = vld [vmem:[#allocation3 + $0xc0] ss:$8 sps:$4 sm:$0xff]  }
0x1686   :  { %v1824_v15 = vmul.f32 %v1822_v8, %v1818_v12  ;;  %v1829_v18 = vadd.f32 %v1828_v2, %v1823_v13  ;;  %v4232_v8 = vld [vmem:[#allocation3 + $0x294] ss:$8 sps:$4 sm:$0xff]   ;;  %v4230_v11 = vld [vmem:[#allocation3 + $0x290] ss:$8 sps:$4 sm:$0xff]   ;;  %v4223_v12 = vld [vmem:[#allocation3 + $0xa4] ss:$8 sps:$4 sm:$0xff]  }
0x1687   :  { %v4221_v13 = vld [vmem:[#allocation3 + $0xa0] ss:$8 sps:$4 sm:$0xff]   ;;  %v4241_v14 = vld [vmem:[#allocation3 + $0xd4] ss:$8 sps:$4 sm:$0xff]  }
0x1688   :  { %v1830_v10 = vadd.f32 %v1828_v2, %v1824_v15  ;;  %v4238_v2 = vld [vmem:[#allocation3 + $0x2a4] ss:$8 sps:$4 sm:$0xff]   ;;  %v4236_v15 = vld [vmem:[#allocation3 + $0x2a0] ss:$8 sps:$4 sm:$0xff]  }
0x168a   :  { %v1832_v20 = vrot.slane %v1830_v10, 7  ;;  %v4229_v10 = vld [vmem:[#allocation3 + $0xb4] ss:$8 sps:$4 sm:$0xff]  }
0x168c   :  { %v1835_v21 = vsel %vm1834_vm7, %v1829_v18, %v1832_v20  ;;  %v4227_v18 = vld [vmem:[#allocation3 + $0xb0] ss:$8 sps:$4 sm:$0xff]  }
0x168d   :  { %v1836_v22 = vpack.c.bf16 %v1835_v21, %v1835_v21  ;;  %v4242_v20 = vld [vmem:[#allocation3 + $0x2b0] ss:$8 sps:$4 sm:$0xff]  }
0x168e   :  { %v4239_v21 = vld [vmem:[#allocation3 + $0xd0] ss:$8 sps:$4 sm:$0xff]  }
0x168f   :  { %3618 = vmatmul.mubr.msk.bf16.vlgmr.msra.gmra.mrb[36].mxu1 %vm105_vm0, %v1836_v22  ;;  %3619 = vmatmul.mubr.msk.bf16.vlgmr.msra.gmra.mrb[32].mxu0 %vm105_vm0, %v1836_v22 }
0x1690   :  { %2284 = vmatpush1.bf16.msra.mxu1 %v3606_v59  ;;  %2325 = vmatpush1.bf16.msra.mxu0 %v3608_v60  ;;  %v4212_v59 = vld [vmem:[#allocation3 + $0x260] ss:$8 sps:$4 sm:$0xff]   ;;  %v4205_v60 = vld [vmem:[#allocation3 + $0x74] ss:$8 sps:$4 sm:$0xff]  }
0x1691   :  { %2285 = vmatprep.subr.bf16.mxu1 %v3615_v23  ;;  %2326 = vmatprep.subr.bf16.mxu0 %v3617_v19 }
0x1692   :  { %2315 = vmatprep.mubr.bf16.mxu1 %v4450_v1  ;;  %2356 = vmatprep.mubr.bf16.mxu0 %v4450_v1  ;;  %v4190_v1 = vld [vmem:[#allocation3 + $0x224] ss:$8 sps:$4 sm:$0xff]  }
0x1694   :  { %2286 = vmatpush1.bf16.msra.mxu1 %v3614_v25  ;;  %2327 = vmatpush1.bf16.msra.mxu0 %v3616_v27 }
0x1695   :  { %3211 = vmatprep.subr.bf16.mxu0 %v4169_v28  ;;  %3293 = vmatprep.subr.bf16.mxu1 %v4178_v16 }
0x1697   :  { %3620 = vmatmul.mubr.msk.bf16.vlgmr.msra.gmra.mrb[40].mxu1 %vm105_vm0, %v1836_v22  ;;  %3621 = vmatmul.mubr.msk.bf16.vlgmr.msra.gmra.mrb[36].mxu0 %vm105_vm0, %v1836_v22  ;;  %v1988_v22 = vpop.f32.mrb[20].mxu0 }
0x1698   :  { %3212 = vmatpush1.bf16.msra.mxu0 %v4167_v29  ;;  %3294 = vmatpush1.bf16.msra.mxu1 %v4176_v30  ;;  %v1990_v23 = vpop.f32.mrb[21].mxu0  ;;  %v5046_v30 = vpop.f32.mrb[32].mxu1 }
0x1699   :  { %3213 = vmatprep.subr.bf16.mxu0 %v4172_v31  ;;  %3295 = vmatprep.subr.bf16.mxu1 %v4184_v33  ;;  %v1992_v19 = vpop.f32.mrb[22].mxu0  ;;  %v5048_v31 = vpop.f32.mrb[33].mxu1 }
0x169a   :  { %v1993_v25 = vpop.f32.mrb[23].mxu0  ;;  %v2074_v33 = vpop.f32.mrb[34].mxu1 }
0x169b   :  { %v2029_v27 = vpop.f32.mrb[24].mxu0 }
0x169c   :  { %3214 = vmatpush1.bf16.msra.mxu0 %v4170_v34  ;;  %3296 = vmatpush1.bf16.msra.mxu1 %v4182_v37  ;;  %v2031_v28 = vpop.f32.mrb[25].mxu0  ;;  %v2075_v34 = vpop.f32.mrb[35].mxu1 }
0x169d   :  { %3215 = vmatprep.subr.bf16.mxu0 %v4175_v38  ;;  %3297 = vmatprep.subr.bf16.mxu1 %v4190_v1  ;;  %v2033_v16 = vpop.f32.mrb[26].mxu0  ;;  %v4265_v34 = vld [vmem:[#allocation3 + $0x114] ss:$8 sps:$4 sm:$0xff]  }
0x169e   :  { %v2034_v29 = vpop.f32.mrb[27].mxu0 }
0x169f   :  { %v5050_v37 = vpop.f32.mrb[28].mxu0 }
0x16a0   :  { %3216 = vmatpush1.bf16.msra.mxu0 %v4173_v39  ;;  %3298 = vmatpush1.bf16.msra.mxu1 %v4188_v35  ;;  %v5052_v38 = vpop.f32.mrb[29].mxu0  ;;  %v4247_v35 = vld [vmem:[#allocation3 + $0xe4] ss:$8 sps:$4 sm:$0xff]  }
0x16a1   :  { %3217 = vmatprep.subr.bf16.mxu0 %v4181_v36  ;;  %3299 = vmatprep.subr.bf16.mxu1 %v4196_v40  ;;  %v2115_v1 = vpop.f32.mrb[30].mxu0  ;;  %v4250_v36 = vld [vmem:[#allocation3 + $0x2c4] ss:$8 sps:$4 sm:$0xff]   ;;  %v4245_v40 = vld [vmem:[#allocation3 + $0xe0] ss:$8 sps:$4 sm:$0xff]  }
0x16a2   :  { %v2116_v39 = vpop.f32.mrb[31].mxu0 }
0x16a4   :  { %3218 = vmatpush1.bf16.msra.mxu0 %v4179_v41  ;;  %3300 = vmatpush1.bf16.msra.mxu1 %v4194_v42  ;;  %v4248_v41 = vld [vmem:[#allocation3 + $0x2c0] ss:$8 sps:$4 sm:$0xff]   ;;  %v4253_v42 = vld [vmem:[#allocation3 + $0xf4] ss:$8 sps:$4 sm:$0xff]  }
0x16a5   :  { %3219 = vmatprep.subr.bf16.mxu0 %v4187_v45  ;;  %3301 = vmatprep.subr.bf16.mxu1 %v4202_v32  ;;  %v4256_v45 = vld [vmem:[#allocation3 + $0x2d4] ss:$8 sps:$4 sm:$0xff]   ;;  %v4251_v32 = vld [vmem:[#allocation3 + $0xf0] ss:$8 sps:$4 sm:$0xff]  }
0x16a8   :  { %3220 = vmatpush1.bf16.msra.mxu0 %v4185_v47  ;;  %3302 = vmatpush1.bf16.msra.mxu1 %v4200_v48  ;;  %v4254_v47 = vld [vmem:[#allocation3 + $0x2d0] ss:$8 sps:$4 sm:$0xff]   ;;  %v4259_v48 = vld [vmem:[#allocation3 + $0x104] ss:$8 sps:$4 sm:$0xff]  }
0x16a9   :  { %3221 = vmatprep.subr.bf16.mxu0 %v4193_v50  ;;  %3303 = vmatprep.subr.bf16.mxu1 %v4208_v51  ;;  %v4262_v50 = vld [vmem:[#allocation3 + $0x2e4] ss:$8 sps:$4 sm:$0xff]   ;;  %v4260_v51 = vld [vmem:[#allocation3 + $0x2e0] ss:$8 sps:$4 sm:$0xff]  }
0x16ac   :  { %3222 = vmatpush1.bf16.msra.mxu0 %v4191_v53  ;;  %3304 = vmatpush1.bf16.msra.mxu1 %v4206_v54  ;;  %v4268_v53 = vld [vmem:[#allocation3 + $0x2f4] ss:$8 sps:$4 sm:$0xff]   ;;  %v4266_v54 = vld [vmem:[#allocation3 + $0x2f0] ss:$8 sps:$4 sm:$0xff]  }
0x16ad   :  { %3223 = vmatprep.subr.bf16.mxu0 %v4199_v55  ;;  %3305 = vmatprep.subr.bf16.mxu1 %v4214_v56  ;;  %v4274_v55 = vld [vmem:[#allocation3 + $0x304] ss:$8 sps:$4 sm:$0xff]  }
0x16ae   :  { %v2365_v56 = vld [vmem:[%s5194_s15] sm:$0xff] }
0x16af   :  { %v2390_v19 = vrot.slane %v2365_v56, %v4793_v26 }
0x16b0   :  { %3224 = vmatpush1.bf16.msra.mxu0 %v4197_v58  ;;  %3306 = vmatpush1.bf16.msra.mxu1 %v4212_v59  ;;  %v2370_v58 = vrot.slane %v2365_v56, %v4625_v44  ;;  %v2378_v59 = vrot.slane %v2365_v56, %v4745_v7  ;;  %v2393_v7 = vsub.s32 6, %v4622_v43 }
0x16b1   :  { %3225 = vmatprep.subr.bf16.mxu0 %v4205_v60  ;;  %3307 = vmatprep.subr.bf16.mxu1 %v4220_v61 }
0x16b4   :  { %3226 = vmatpush1.bf16.msra.mxu0 %v4203_v62  ;;  %3308 = vmatpush1.bf16.msra.mxu1 %v4218_v63  ;;  %v2374_v62 = vrot.slane %v2365_v56, %v4632_v49  ;;  %v2382_v63 = vrot.slane %v2365_v56, %v4772_v52 }
0x16b5   :  { %3227 = vmatprep.subr.bf16.mxu0 %v4211_v0  ;;  %3309 = vmatprep.subr.bf16.mxu1 %v4226_v3 }
0x16b8   :  { %3228 = vmatpush1.bf16.msra.mxu0 %v4209_v6  ;;  %3310 = vmatpush1.bf16.msra.mxu1 %v4224_v4 }
0x16b9   :  { %3229 = vmatprep.subr.bf16.mxu0 %v4217_v5  ;;  %3311 = vmatprep.subr.bf16.mxu1 %v4232_v8 }
0x16bc   :  { %3230 = vmatpush1.bf16.msra.mxu0 %v4215_v9  ;;  %3312 = vmatpush1.bf16.msra.mxu1 %v4230_v11 }
0x16bd   :  { %3231 = vmatprep.subr.bf16.mxu0 %v4223_v12  ;;  %3313 = vmatprep.subr.bf16.mxu1 %v4238_v2 }
0x16c0   :  { %3232 = vmatpush1.bf16.msra.mxu0 %v4221_v13  ;;  %3314 = vmatpush1.bf16.msra.mxu1 %v4236_v15 }
0x16c1   :  { %3233 = vmatprep.subr.bf16.mxu0 %v4229_v10  ;;  %3315 = vmatprep.subr.bf16.mxu1 %v4244_v17 }
0x16c4   :  { %3234 = vmatpush1.bf16.msra.mxu0 %v4227_v18  ;;  %3316 = vmatpush1.bf16.msra.mxu1 %v4242_v20  ;;  %v2397_v18 = vsub.s32 7, %v4622_v43 }
0x16c5   :  { %3235 = vmatprep.subr.bf16.mxu0 %v4235_v57  ;;  %3317 = vmatprep.subr.bf16.mxu1 %v4250_v36 }
0x16c6   :  { %v2398_v25 = vrot.slane %v2365_v56, %v2397_v18  ;;  %v4305_v18 = vld [vmem:[#allocation3 + $0x180] ss:$8 sps:$4 sm:$0xff]  }
0x16c8   :  { %3236 = vmatpush1.bf16.msra.mxu0 %v4233_v46  ;;  %3318 = vmatpush1.bf16.msra.mxu1 %v4248_v41  ;;  %v2386_v46 = vrot.slane %v2365_v56, %v4788_v24 }
0x16c9   :  { %3237 = vmatprep.subr.bf16.mxu0 %v4241_v14  ;;  %3319 = vmatprep.subr.bf16.mxu1 %v4256_v45  ;;  %v2394_v14 = vrot.slane %v2365_v56, %v2393_v7  ;;  %v4302_v7 = vld [vmem:[#allocation3 + $0x350] ss:$8 sps:$4 sm:$0xff]  }
0x16cc   :  { %3238 = vmatpush1.bf16.msra.mxu0 %v4239_v21  ;;  %3320 = vmatpush1.bf16.msra.mxu1 %v4254_v47  ;;  %v4271_v47 = vld [vmem:[#allocation3 + $0x124] ss:$8 sps:$4 sm:$0xff]  }
0x16cd   :  { %3239 = vmatprep.subr.bf16.mxu0 %v4247_v35  ;;  %3321 = vmatprep.subr.bf16.mxu1 %v4262_v50  ;;  %v4269_v50 = vld [vmem:[#allocation3 + $0x120] ss:$8 sps:$4 sm:$0xff]  }
0x16d0   :  { %3240 = vmatpush1.bf16.msra.mxu0 %v4245_v40  ;;  %3322 = vmatpush1.bf16.msra.mxu1 %v4260_v51  ;;  %v4272_v51 = vld [vmem:[#allocation3 + $0x300] ss:$8 sps:$4 sm:$0xff]  }
0x16d1   :  { %3241 = vmatprep.subr.bf16.mxu0 %v4253_v42  ;;  %3323 = vmatprep.subr.bf16.mxu1 %v4268_v53 }
0x16d4   :  { %3242 = vmatpush1.bf16.msra.mxu0 %v4251_v32  ;;  %3324 = vmatpush1.bf16.msra.mxu1 %v4266_v54  ;;  %v4277_v54 = vld [vmem:[#allocation3 + $0x134] ss:$8 sps:$4 sm:$0xff]  }
0x16d5   :  { %3252 = vmatprep.subr.bf16.mxu0 %v4259_v48  ;;  %3334 = vmatprep.subr.bf16.mxu1 %v4274_v55  ;;  %v4280_v55 = vld [vmem:[#allocation3 + $0x314] ss:$8 sps:$4 sm:$0xff]  }
0x1762   :  { %v2235_v60 = vpop.f32.mrb[36].mxu1  ;;  %v2276_v61 = vpop.f32.mrb[32].mxu0 }
0x1763   :  { %v2236_v0 = vadd.f32 %v2235_v60, %v1988_v22  ;;  %v2277_v3 = vadd.f32 %v2276_v61, %v2029_v27  ;;  %v2237_v6 = vpop.f32.mrb[37].mxu1  ;;  %v2278_v4 = vpop.f32.mrb[33].mxu0  ;;  %v4257_v27 = vld [vmem:[#allocation3 + $0x100] ss:$8 sps:$4 sm:$0xff]   ;;  %v4283_v60 = vld [vmem:[#allocation3 + $0x144] ss:$8 sps:$4 sm:$0xff]  }
0x1764   :  { %v2238_v5 = vadd.f32 %v2237_v6, %v1990_v23  ;;  %v2279_v8 = vadd.f32 %v2278_v4, %v2031_v28  ;;  %v2239_v9 = vpop.f32.mrb[38].mxu1  ;;  %v2280_v11 = vpop.f32.mrb[34].mxu0  ;;  %v4286_v61 = vld [vmem:[#allocation3 + $0x324] ss:$8 sps:$4 sm:$0xff]   ;;  %v4287_v6 = vld [vmem:[#allocation3 + $0x150] ss:$8 sps:$4 sm:$0xff]  }
0x1765   :  { %v2407_v12 = vadd.f32 %v2370_v58, %v2236_v0  ;;  %v5061_v2 = vadd.f32 %v2378_v59, %v2277_v3  ;;  %v2240_v13 = vpop.f32.mrb[39].mxu1  ;;  %v2281_v15 = vpop.f32.mrb[35].mxu0  ;;  %v4275_v58 = vld [vmem:[#allocation3 + $0x130] ss:$8 sps:$4 sm:$0xff]   ;;  %v4289_v0 = vld [vmem:[#allocation3 + $0x154] ss:$8 sps:$4 sm:$0xff]  }
0x1766   :  { %v2408_v10 = vadd.f32 %v2374_v62, %v2238_v5  ;;  %v2410_v17 = vadd.f32 %v2382_v63, %v2279_v8  ;;  %v4278_v59 = vld [vmem:[#allocation3 + $0x310] ss:$8 sps:$4 sm:$0xff]   ;;  %v4281_v62 = vld [vmem:[#allocation3 + $0x140] ss:$8 sps:$4 sm:$0xff]   ;;  %v4292_v3 = vld [vmem:[#allocation3 + $0x334] ss:$8 sps:$4 sm:$0xff]  }
0x1767   :  { %v2415_v52 = vmax.f32 %v2407_v12, 0.0  ;;  %v4284_v63 = vld [vmem:[#allocation3 + $0x320] ss:$8 sps:$4 sm:$0xff]   ;;  %v4290_v4 = vld [vmem:[#allocation3 + $0x330] ss:$8 sps:$4 sm:$0xff]  }
0x1768   :  { %v2416_v20 = vmax.f32 %v2408_v10, 0.0  ;;  %v2418_v57 = vmax.f32 %v2410_v17, 0.0  ;;  %v4295_v5 = vld [vmem:[#allocation3 + $0x164] ss:$8 sps:$4 sm:$0xff]   ;;  %v4293_v9 = vld [vmem:[#allocation3 + $0x160] ss:$8 sps:$4 sm:$0xff]  }
0x1769   :  { %v2423_v28 = vpack.c.bf16 %v2415_v52, %v2415_v52  ;;  %v4298_v8 = vld [vmem:[#allocation3 + $0x344] ss:$8 sps:$4 sm:$0xff]   ;;  %v4296_v11 = vld [vmem:[#allocation3 + $0x340] ss:$8 sps:$4 sm:$0xff]   ;;  %v4301_v12 = vld [vmem:[#allocation3 + $0x174] ss:$8 sps:$4 sm:$0xff]  }
0x176a   :  { %v2424_v21 = vpack.c.bf16 %v2416_v20, %v2416_v20  ;;  %v2317_v22 = vpop.f32.mrb[40].mxu1  ;;  %v2358_v23 = vpop.f32.mrb[36].mxu0  ;;  %v2426_v1 = vpack.c.bf16 %v2418_v57, %v2418_v57  ;;  %v4304_v13 = vld [vmem:[#allocation3 + $0x354] ss:$8 sps:$4 sm:$0xff]   ;;  %v4299_v15 = vld [vmem:[#allocation3 + $0x170] ss:$8 sps:$4 sm:$0xff]  }
0x176b   :  { %v2318_v16 = vadd.f32 %v2317_v22, %v5046_v30  ;;  %v2359_v29 = vadd.f32 %v2358_v23, %v5050_v37  ;;  %v2319_v33 = vpop.f32.mrb[41].mxu1  ;;  %v2360_v43 = vpop.f32.mrb[37].mxu0  ;;  %v4263_v37 = vld [vmem:[#allocation3 + $0x110] ss:$8 sps:$4 sm:$0xff]   ;;  %v4307_v10 = vld [vmem:[#allocation3 + $0x184] ss:$8 sps:$4 sm:$0xff]  }
0x176c   :  { %v2320_v39 = vadd.f32 %v2319_v33, %v5048_v31  ;;  %v2361_v24 = vadd.f32 %v2360_v43, %v5052_v38  ;;  %v2321_v35 = vpop.f32.mrb[42].mxu1  ;;  %v2362_v36 = vpop.f32.mrb[38].mxu0  ;;  %3243 = vmatprep.mubr.bf16.mxu0 %v2424_v21  ;;  %v4310_v17 = vld [vmem:[#allocation3 + $0x364] ss:$8 sps:$4 sm:$0xff]   ;;  %v4308_v52 = vld [vmem:[#allocation3 + $0x360] ss:$8 sps:$4 sm:$0xff]  }
0x176d   :  { %v2411_v40 = vadd.f32 %v2386_v46, %v2318_v16  ;;  %v5071_v26 = vadd.f32 %v2394_v14, %v2359_v29  ;;  %v2322_v41 = vpop.f32.mrb[43].mxu1  ;;  %v2363_v42 = vpop.f32.mrb[39].mxu0  ;;  %3244 = vmatmul.mubr.bf16.vlgmr.msra.gmra.mrb[40].mxu0 %v2423_v28  ;;  %v4313_v20 = vld [vmem:[#allocation3 + $0x194] ss:$8 sps:$4 sm:$0xff]   ;;  %v4311_v46 = vld [vmem:[#allocation3 + $0x190] ss:$8 sps:$4 sm:$0xff]  }
0x176e   :  { %v2412_v30 = vadd.f32 %v2390_v19, %v2320_v39  ;;  %v2414_v45 = vadd.f32 %v2398_v25, %v2361_v24  ;;  %3253 = vmatpush1.bf16.msra.mxu0 %v4257_v27  ;;  %3284 = vmatprep.mubr.bf16.mxu0 %v2426_v1  ;;  %v4316_v57 = vld [vmem:[#allocation3 + $0x374] ss:$8 sps:$4 sm:$0xff]   ;;  %v4314_v14 = vld [vmem:[#allocation3 + $0x370] ss:$8 sps:$4 sm:$0xff]   ;;  %v4319_v21 = vld [vmem:[#allocation3 + $0x1a4] ss:$8 sps:$4 sm:$0xff]  }
0x176f   :  { %v2419_v32 = vmax.f32 %v2411_v40, 0.0  ;;  %3254 = vmatprep.subr.bf16.mxu0 %v4265_v34  ;;  %v4322_v22 = vld [vmem:[#allocation3 + $0x384] ss:$8 sps:$4 sm:$0xff]   ;;  %v4317_v23 = vld [vmem:[#allocation3 + $0x1a0] ss:$8 sps:$4 sm:$0xff]  }
0x1770   :  { %v2420_v31 = vmax.f32 %v2412_v30, 0.0  ;;  %v2422_v48 = vmax.f32 %v2414_v45, 0.0  ;;  %v4320_v19 = vld [vmem:[#allocation3 + $0x380] ss:$8 sps:$4 sm:$0xff]   ;;  %v4325_v25 = vld [vmem:[#allocation3 + $0x1b4] ss:$8 sps:$4 sm:$0xff]  }
0x1771   :  { %v2427_v53 = vpack.c.bf16 %v2419_v32, %v2419_v32  ;;  %v4328_v27 = vld [vmem:[#allocation3 + $0x394] ss:$8 sps:$4 sm:$0xff]   ;;  %v4323_v28 = vld [vmem:[#allocation3 + $0x1b0] ss:$8 sps:$4 sm:$0xff]   ;;  %v4331_v29 = vld [vmem:[#allocation3 + $0x1c4] ss:$8 sps:$4 sm:$0xff]  }
0x1772   :  { %v2428_v38 = vpack.c.bf16 %v2420_v31, %v2420_v31  ;;  %3255 = vmatpush1.bf16.msra.mxu0 %v4263_v37  ;;  %v2430_v56 = vpack.c.bf16 %v2422_v48, %v2422_v48  ;;  %v4326_v16 = vld [vmem:[#allocation3 + $0x390] ss:$8 sps:$4 sm:$0xff]   ;;  %v4334_v33 = vld [vmem:[#allocation3 + $0x3a4] ss:$8 sps:$4 sm:$0xff]   ;;  %v4329_v43 = vld [vmem:[#allocation3 + $0x1c0] ss:$8 sps:$4 sm:$0xff]  }
0x1773   :  { %3256 = vmatprep.subr.bf16.mxu0 %v4271_v47  ;;  %v4332_v34 = vld [vmem:[#allocation3 + $0x3a0] ss:$8 sps:$4 sm:$0xff]   ;;  %v4337_v1 = vld [vmem:[#allocation3 + $0x1d4] ss:$8 sps:$4 sm:$0xff]   ;;  %v4335_v24 = vld [vmem:[#allocation3 + $0x1d0] ss:$8 sps:$4 sm:$0xff]  }
0x1774   :  { %3325 = vmatprep.mubr.bf16.mxu1 %v2428_v38  ;;  %v4340_v39 = vld [vmem:[#allocation3 + $0x3b4] ss:$8 sps:$4 sm:$0xff]   ;;  %v4338_v35 = vld [vmem:[#allocation3 + $0x3b0] ss:$8 sps:$4 sm:$0xff]   ;;  %v4343_v36 = vld [vmem:[#allocation3 + $0x1e4] ss:$8 sps:$4 sm:$0xff]  }
0x1775   :  { %3326 = vmatmul.mubr.bf16.vlgmr.msra.gmra.mrb[44].mxu1 %v2427_v53  ;;  %v4346_v40 = vld [vmem:[#allocation3 + $0x3c4] ss:$8 sps:$4 sm:$0xff]   ;;  %v4341_v41 = vld [vmem:[#allocation3 + $0x1e0] ss:$8 sps:$4 sm:$0xff]   ;;  %v4349_v30 = vld [vmem:[#allocation3 + $0x1f4] ss:$8 sps:$4 sm:$0xff]  }
0x1776   :  { %3257 = vmatpush1.bf16.msra.mxu0 %v4269_v50  ;;  %3335 = vmatpush1.bf16.msra.mxu1 %v4272_v51  ;;  %v4344_v42 = vld [vmem:[#allocation3 + $0x3c0] ss:$8 sps:$4 sm:$0xff]   ;;  %v4352_v45 = vld [vmem:[#allocation3 + $0x3d4] ss:$8 sps:$4 sm:$0xff]   ;;  %v4347_v47 = vld [vmem:[#allocation3 + $0x1f0] ss:$8 sps:$4 sm:$0xff]  }
0x1777   :  { %3366 = vmatprep.mubr.bf16.mxu1 %v2430_v56  ;;  %3258 = vmatprep.subr.bf16.mxu0 %v4277_v54  ;;  %v3393_v37 = vld [vmem:[%s5197_s18 + $0x80] sm:$0xff]  ;;  %v3394_v32 = vld [vmem:[%s5197_s18 + $0x88] sm:$0xff]  ;;  %v4350_v31 = vld [vmem:[#allocation3 + $0x3d0] ss:$8 sps:$4 sm:$0xff]   ;;  %v2417_v48 = vmax.f32 %v5061_v2, 0.0 }
0x1778   :  { %3336 = vmatprep.subr.bf16.mxu1 %v4280_v55  ;;  %v4355_v38 = vld [vmem:[#allocation3 + $0x3e4] ss:$8 sps:$4 sm:$0xff]   ;;  %v4040_v50 = vpack.c.bf16 %v3394_v32, %v3393_v37  ;;  %v3396_v2 = vld [vmem:[%s5197_s18 + $0x98] sm:$0xff]  ;;  %v4353_v55 = vld [vmem:[#allocation3 + $0x3e0] ss:$8 sps:$4 sm:$0xff]  }
0x1779   :  { %v3377_v51 = vld [vmem:[%s5197_s18] sm:$0xff]  ;;  %v3378_v53 = vld [vmem:[%s5197_s18 + $0x8] sm:$0xff]  ;;  %v3395_v54 = vld [vmem:[%s5197_s18 + $0x90] sm:$0xff] }
0x177a   :  { %3259 = vmatpush1.bf16.msra.mxu0 %v4275_v58  ;;  %3337 = vmatpush1.bf16.msra.mxu1 %v4278_v59  ;;  %v4042_v56 = vpack.c.bf16 %v3378_v53, %v3377_v51  ;;  %v2425_v58 = vpack.c.bf16 %v2417_v48, %v2417_v48  ;;  %v4358_v59 = vld [vmem:[#allocation3 + $0x3f4] ss:$8 sps:$4 sm:$0xff]  }
0x177b   :  { %3260 = vmatprep.subr.bf16.mxu0 %v4283_v60  ;;  %3338 = vmatprep.subr.bf16.mxu1 %v4286_v61  ;;  %v4044_v60 = vpack.c.bf16 %v3396_v2, %v3395_v54  ;;  %v3379_v61 = vld [vmem:[%s5197_s18 + $0x10] sm:$0xff] }
0x177e   :  { %3261 = vmatpush1.bf16.msra.mxu0 %v4281_v62  ;;  %3339 = vmatpush1.bf16.msra.mxu1 %v4284_v63  ;;  %v3380_v62 = vld [vmem:[%s5197_s18 + $0x18] sm:$0xff]  ;;  %v3397_v63 = vld [vmem:[%s5197_s18 + $0xa0] sm:$0xff] }
0x177f   :  { %3262 = vmatprep.subr.bf16.mxu0 %v4289_v0  ;;  %3340 = vmatprep.subr.bf16.mxu1 %v4292_v3  ;;  %v3398_v0 = vld [vmem:[%s5197_s18 + $0xa8] sm:$0xff]  ;;  %v4356_v3 = vld [vmem:[#allocation3 + $0x3f0] ss:$8 sps:$4 sm:$0xff]  }
0x1782   :  { %3263 = vmatpush1.bf16.msra.mxu0 %v4287_v6  ;;  %3341 = vmatpush1.bf16.msra.mxu1 %v4290_v4  ;;  %v4046_v6 = vpack.c.bf16 %v3380_v62, %v3379_v61  ;;  %v2421_v4 = vmax.f32 %v5071_v26, 0.0 }
0x1783   :  { %3264 = vmatprep.subr.bf16.mxu0 %v4295_v5  ;;  %3342 = vmatprep.subr.bf16.mxu1 %v4298_v8  ;;  %v4048_v5 = vpack.c.bf16 %v3398_v0, %v3397_v63  ;;  %v3381_v8 = vld [vmem:[%s5197_s18 + $0x20] sm:$0xff] }
0x1786   :  { %3265 = vmatpush1.bf16.msra.mxu0 %v4293_v9  ;;  %3343 = vmatpush1.bf16.msra.mxu1 %v4296_v11  ;;  %v3382_v9 = vld [vmem:[%s5197_s18 + $0x28] sm:$0xff]  ;;  %v3399_v11 = vld [vmem:[%s5197_s18 + $0xb0] sm:$0xff] }
0x1787   :  { %3266 = vmatprep.subr.bf16.mxu0 %v4301_v12  ;;  %3344 = vmatprep.subr.bf16.mxu1 %v4304_v13  ;;  %v3400_v12 = vld [vmem:[%s5197_s18 + $0xb8] sm:$0xff]  ;;  %v4050_v26 = vpack.c.bf16 %v3382_v9, %v3381_v8  ;;  %v2429_v13 = vpack.c.bf16 %v2421_v4, %v2421_v4 }
0x178a   :  { %3267 = vmatpush1.bf16.msra.mxu0 %v4299_v15  ;;  %3345 = vmatpush1.bf16.msra.mxu1 %v4302_v7  ;;  %v4052_v15 = vpack.c.bf16 %v3400_v12, %v3399_v11  ;;  %v3383_v7 = vld [vmem:[%s5197_s18 + $0x30] sm:$0xff] }
0x178b   :  { %3268 = vmatprep.subr.bf16.mxu0 %v4307_v10  ;;  %3346 = vmatprep.subr.bf16.mxu1 %v4310_v17  ;;  %v3384_v10 = vld [vmem:[%s5197_s18 + $0x38] sm:$0xff]  ;;  %v3401_v17 = vld [vmem:[%s5197_s18 + $0xc0] sm:$0xff] }
0x178e   :  { %3269 = vmatpush1.bf16.msra.mxu0 %v4305_v18  ;;  %3347 = vmatpush1.bf16.msra.mxu1 %v4308_v52  ;;  %v3402_v18 = vld [vmem:[%s5197_s18 + $0xc8] sm:$0xff]  ;;  %v4054_v52 = vpack.c.bf16 %v3384_v10, %v3383_v7 }
0x178f   :  { %3270 = vmatprep.subr.bf16.mxu0 %v4313_v20  ;;  %3348 = vmatprep.subr.bf16.mxu1 %v4316_v57  ;;  %v4056_v20 = vpack.c.bf16 %v3402_v18, %v3401_v17  ;;  %v3385_v57 = vld [vmem:[%s5197_s18 + $0x40] sm:$0xff] }
0x1792   :  { %3271 = vmatpush1.bf16.msra.mxu0 %v4311_v46  ;;  %3349 = vmatpush1.bf16.msra.mxu1 %v4314_v14  ;;  %v3386_v46 = vld [vmem:[%s5197_s18 + $0x48] sm:$0xff] }
0x1793   :  { %3272 = vmatprep.subr.bf16.mxu0 %v4319_v21  ;;  %3350 = vmatprep.subr.bf16.mxu1 %v4322_v22  ;;  %v4058_v14 = vpack.c.bf16 %v3386_v46, %v3385_v57  ;;  %v3403_v21 = vld [vmem:[%s5197_s18 + $0xd0] sm:$0xff]  ;;  %v3404_v22 = vld [vmem:[%s5197_s18 + $0xd8] sm:$0xff] }
0x1796   :  { %3273 = vmatpush1.bf16.msra.mxu0 %v4317_v23  ;;  %3351 = vmatpush1.bf16.msra.mxu1 %v4320_v19  ;;  %v4060_v23 = vpack.c.bf16 %v3404_v22, %v3403_v21  ;;  %v3387_v19 = vld [vmem:[%s5197_s18 + $0x50] sm:$0xff] }
0x1797   :  { %3274 = vmatprep.subr.bf16.mxu0 %v4325_v25  ;;  %3352 = vmatprep.subr.bf16.mxu1 %v4328_v27  ;;  %v3388_v25 = vld [vmem:[%s5197_s18 + $0x58] sm:$0xff] }
0x1798   :  { %v4062_v27 = vpack.c.bf16 %v3388_v25, %v3387_v19 }
0x179a   :  { %3275 = vmatpush1.bf16.msra.mxu0 %v4323_v28  ;;  %3353 = vmatpush1.bf16.msra.mxu1 %v4326_v16  ;;  %v3405_v28 = vld [vmem:[%s5197_s18 + $0xe0] sm:$0xff]  ;;  %v3406_v16 = vld [vmem:[%s5197_s18 + $0xe8] sm:$0xff] }
0x179b   :  { %3276 = vmatprep.subr.bf16.mxu0 %v4331_v29  ;;  %3354 = vmatprep.subr.bf16.mxu1 %v4334_v33  ;;  %v4064_v29 = vpack.c.bf16 %v3406_v16, %v3405_v28  ;;  %v3389_v33 = vld [vmem:[%s5197_s18 + $0x60] sm:$0xff] }
0x179e   :  { %3277 = vmatpush1.bf16.msra.mxu0 %v4329_v43  ;;  %3355 = vmatpush1.bf16.msra.mxu1 %v4332_v34  ;;  %v3390_v43 = vld [vmem:[%s5197_s18 + $0x68] sm:$0xff] }
0x179f   :  { %3278 = vmatprep.subr.bf16.mxu0 %v4337_v1  ;;  %3356 = vmatprep.subr.bf16.mxu1 %v4340_v39  ;;  %v4066_v34 = vpack.c.bf16 %v3390_v43, %v3389_v33  ;;  %v3407_v1 = vld [vmem:[%s5197_s18 + $0xf0] sm:$0xff]  ;;  %v3408_v39 = vld [vmem:[%s5197_s18 + $0xf8] sm:$0xff] }
0x17a2   :  { %3279 = vmatpush1.bf16.msra.mxu0 %v4335_v24  ;;  %3357 = vmatpush1.bf16.msra.mxu1 %v4338_v35  ;;  %v4068_v24 = vpack.c.bf16 %v3408_v39, %v3407_v1  ;;  %v3391_v35 = vld [vmem:[%s5197_s18 + $0x70] sm:$0xff] }
0x17a3   :  { %3280 = vmatprep.subr.bf16.mxu0 %v4343_v36  ;;  %3358 = vmatprep.subr.bf16.mxu1 %v4346_v40  ;;  %v3392_v36 = vld [vmem:[%s5197_s18 + $0x78] sm:$0xff] }
0x17a4   :  { %v4070_v40 = vpack.c.bf16 %v3392_v36, %v3391_v35 }
0x17a6   :  { %3281 = vmatpush1.bf16.msra.mxu0 %v4341_v41  ;;  %3359 = vmatpush1.bf16.msra.mxu1 %v4344_v42  ;;  %v2559_v41 = vld [vmem:[%s5196_s17] sm:$0x3] }
0x17a7   :  { %3282 = vmatprep.subr.bf16.mxu0 %v4349_v30  ;;  %3360 = vmatprep.subr.bf16.mxu1 %v4352_v45  ;;  %v2564_v37 = vrot.slane %v2559_v41, %v4625_v44 }
0x17aa   :  { %3283 = vmatpush1.bf16.msra.mxu0 %v4347_v47  ;;  %3361 = vmatpush1.bf16.msra.mxu1 %v4350_v31  ;;  %v2568_v47 = vrot.slane %v2559_v41, %v4632_v49 }
0x17ab   :  { %3362 = vmatprep.subr.bf16.mxu1 %v4355_v38  ;;  %4041 = vmatprep.subr.bf16.mxu0 %v4040_v50 }
0x17ad   :  { %3285 = vmatmul.mubr.bf16.vlgmr.msra.gmra.mrb[40].mxu0 %v2425_v58 }
0x17ae   :  { %3363 = vmatpush1.bf16.msra.mxu1 %v4353_v55  ;;  %4043 = vmatpush3.bf16.msra.mxu0 %v4042_v56 }
0x17af   :  { %3364 = vmatprep.subr.bf16.mxu1 %v4358_v59  ;;  %4045 = vmatprep.subr.bf16.mxu0 %v4044_v60  ;;  %v3750_v59 = vld [vmem:[#allocation2] ss:$0 sm:$0xff] }
0x17b2   :  { %3365 = vmatpush1.bf16.msra.mxu1 %v4356_v3  ;;  %4047 = vmatpush3.bf16.msra.mxu0 %v4046_v6 }
0x17b3   :  { %4049 = vmatprep.subr.bf16.mxu0 %v4048_v5 }
0x17b5   :  { %3367 = vmatmul.mubr.bf16.vlgmr.msra.gmra.mrb[44].mxu1 %v2429_v13 }
0x17b6   :  { %4051 = vmatpush3.bf16.msra.mxu0 %v4050_v26 }
0x17b7   :  { %4053 = vmatprep.subr.bf16.mxu0 %v4052_v15 }
0x17ba   :  { %4055 = vmatpush3.bf16.msra.mxu0 %v4054_v52 }
0x17bb   :  { %4057 = vmatprep.subr.bf16.mxu0 %v4056_v20 }
0x17be   :  { %4059 = vmatpush3.bf16.msra.mxu0 %v4058_v14 }
0x17bf   :  { %4061 = vmatprep.subr.bf16.mxu0 %v4060_v23 }
0x17c2   :  { %4063 = vmatpush3.bf16.msra.mxu0 %v4062_v27 }
0x17c3   :  { %4065 = vmatprep.subr.bf16.mxu0 %v4064_v29 }
0x17c6   :  { %4067 = vmatpush3.bf16.msra.mxu0 %v4066_v34 }
0x17c7   :  { %4069 = vmatprep.subr.bf16.mxu0 %v4068_v24 }
0x17ca   :  { %4071 = vmatpush3.bf16.msra.mxu0 %v4070_v40 }
0x1880   :  { %v3286_v42 = vpop.f32.mrb[40].mxu0 }
0x1881   :  { %v3288_v30 = vpop.f32.mrb[41].mxu0  ;;  %v4072_v31 = vadd.f32 %v3286_v42, %v2564_v37 }
0x1882   :  { %v3290_v45 = vpop.f32.mrb[42].mxu0  ;;  %v4074_v48 = vadd.f32 %v3288_v30, %v2568_v47 }
0x1883   :  { %v3291_v32 = vpop.f32.mrb[43].mxu0 }
0x1888   :  { %v3368_v38 = vpop.f32.mrb[44].mxu1 }
0x1889   :  { %v4073_v50 = vadd.f32 %v4072_v31, %v3368_v38  ;;  %v3370_v51 = vpop.f32.mrb[45].mxu1 }
0x188a   :  { %v4075_v53 = vadd.f32 %v4074_v48, %v3370_v51  ;;  %v3372_v54 = vpop.f32.mrb[46].mxu1 }
0x188b   :  { %v3373_v2 = vpop.f32.mrb[47].mxu1  ;;  %v3375_v56 = vmax.f32 %v4073_v50, 0.0 }
0x188c   :  { %v3376_v55 = vmax.f32 %v4075_v53, 0.0 }
0x188e   :  { %3480 = vmatprep.mubr.f32.mxu0 %v3376_v55 }
0x188f   :  { %3481 = vmatmul.mubr.f32.vlgmr.msra.gmra.mrb[44].mxu0 %v3375_v56 }
0x1962   :  { %v3850_v58 = vpop.f32.mrb[44].mxu0 }
0x1963   :  { %v3851_v60 = vpop.f32.mrb[45].mxu0 }
0x1964   :  { %v3852_v61 = vadd.f32 %v3851_v60, %v3850_v58 }
0x1966   :  { %v3483_v44 = vadd.f32 %v3852_v61, %v3750_v59 }
0x1968   :  { %v3751_v62 = vmul.f32 -1.442695, %v3483_v44 }
0x196a   :  { %4419 = vpow2.f32 %v3751_v62 }
0x1974   :  { %v4420_v49 = vpop.eup %4419 }
0x1975   :  { %v3489_v63 = vadd.f32 1.0, %v4420_v49 }
0x1977   :  { %4421 = vrcp.f32 %v3489_v63 }
0x1981   :  { %v4422_v0 = vpop.eup %4421 }
0x1982   :  { %3493 = vst.msk [vmem:[%s5199_s20] sm:$0x3] %vm3492_vm8, %v4422_v0 }
0x1983   :  { %3498 = vsyncpa [#allocation4], 1 }

</bundles_post_ra>
